<compile_context>
chip_gen: v7x
topology: tpu7x:2x2x1
jax: 0.10.0
libtpu: 0.0.40
codegen_flags: <defaults>
</compile_context>

<pallas_src>
import jax
import jax.numpy as jnp
from jax import lax
from jax.experimental import pallas as pl
from jax.experimental.pallas import tpu as pltpu

# ---------------- model hyper-parameters (small, forward-consistent) ----------------
F_IN = 16      # dataset.num_features
HIDDEN = 8     # hidden_channels
HEADS = 4      # heads
OUT = 8        # out_channels
N0, N1, N2 = 32, 16, 8   # node counts: layer-0 src, layer-0 dst / layer-1 src, layer-1 dst
B = 2          # sampled subgraphs batched per pallas_call (one grid step each)

C0 = HEADS * HIDDEN          # 32 (layer-0 GAT width, concat=True)
C1 = HEADS * OUT             # 32 (layer-1 GAT width before head-mean)
W0_COLS = C0 + C0 + HEADS    # [GAT proj | skip proj | folded att_dst]  = 68
W1_COLS = C1 + OUT + HEADS   # [GAT proj | skip proj | folded att_dst]  = 44
BIAS_COLS = C0 + OUT         # 40
OUT_COLS = OUT + N2          # 16  (log_softmax || z@z.T)

NEG_BIG = -1e30              # plain Python float — NOT a jax array (no captured consts)


# ---------------------------------- fused Pallas kernel ----------------------------------
def _gatnet_kernel(x_ref, mask0_ref, mask1_ref,
                   w0_ref, w1_ref, asrc_ref, bias_ref,
                   out_ref):
    f32, bf16 = jnp.float32, jnp.bfloat16

    x = x_ref[...]                                      # [N0, F_IN] f32
    mask0 = mask0_ref[...].astype(f32)                  # [N1, N0]
    mask1 = mask1_ref[...].astype(f32)                  # [N2, N1]
    asrc0 = asrc_ref[0:HEADS, :]                        # [H, C0] bf16 (block-diag att_src0)
    asrc1 = asrc_ref[HEADS:2 * HEADS, :]                # [H, C1] bf16 (block-diag att_src1)
    bias0 = bias_ref[:, :C0]                            # [1, C0]  (bias0 + skipb0)
    bias1 = bias_ref[:, C0:C0 + OUT]                    # [1, OUT] (bias1 + skipb1)

    def attention(adst_col, asrc_row, mask, xs_head_bf16):
        """One head: masked-softmax attention + aggregation."""
        e = adst_col + asrc_row                          # [Nd, Ns]
        e = jnp.where(e > 0, e, 0.2 * e)                 # leaky_relu(0.2)
        e = jnp.where(mask > 0, e, NEG_BIG)
        m = jnp.max(e, axis=-1, keepdims=True)           # finite: every dst has a self-loop
        p = jnp.exp(e - m) * mask
        denom = jnp.sum(p, axis=-1, keepdims=True) + 1e-16   # PyG softmax eps; denom >= ~1
        attn = p * pl.reciprocal(denom, approx=True)          # EUP reciprocal
        return jnp.dot(attn.astype(bf16), xs_head_bf16,
                       preferred_element_type=f32)            # [Nd, Chead]

    # ---- layer 0: GATConv(F_IN -> HIDDEN, heads=HEADS, concat=True) + skip + ELU ----
    # One packed matmul: [GAT proj | skip proj | alpha_dst(all heads)].
    xcat0 = jnp.dot(x.astype(bf16), w0_ref[...], preferred_element_type=f32)   # [N0, 68]
    xs0 = xcat0[:, :C0]                                 # source projection (shared Linear)
    skip0 = xcat0[:N1, C0:2 * C0]                       # Lin_0(x_target) (dst = prefix of src)
    adst0 = xcat0[:N1, 2 * C0:2 * C0 + HEADS]           # [N1, H]  alpha_dst per head
    xs0_b = xs0.astype(bf16)
    # alpha_src rows for ALL heads in one matmul: [H, C0] x [N0, C0]^T -> [H, N0]
    asrc_rows0 = lax.dot_general(asrc0, xs0_b, (((1,), (1,)), ((), ())),
                                 preferred_element_type=f32)

    head_outs = [
        attention(adst0[:, h:h + 1], asrc_rows0[h:h + 1, :], mask0,
                  xs0_b[:, h * HIDDEN:(h + 1) * HIDDEN])
        for h in range(HEADS)
    ]
    h0 = jnp.concatenate(head_outs, axis=-1) + skip0 + bias0                  # [N1, C0]
    h0 = jnp.where(h0 > 0, h0, jnp.exp(jnp.minimum(h0, 0.0)) - 1.0)           # ELU(alpha=1)
    # F.dropout(p=0.5, training=False) -> identity in eval mode.

    # ---- layer 1: GATConv(C0 -> OUT, heads=HEADS, concat=False) + skip ----
    xcat1 = jnp.dot(h0.astype(bf16), w1_ref[...], preferred_element_type=f32)  # [N1, 44]
    xs1 = xcat1[:, :C1]
    skip1 = xcat1[:N2, C1:C1 + OUT]
    adst1 = xcat1[:N2, C1 + OUT:C1 + OUT + HEADS]        # [N2, H]
    xs1_b = xs1.astype(bf16)
    asrc_rows1 = lax.dot_general(asrc1, xs1_b, (((1,), (1,)), ((), ())),
                                 preferred_element_type=f32)                   # [H, N1]

    acc = None
    for h in range(HEADS):
        o = attention(adst1[:, h:h + 1], asrc_rows1[h:h + 1, :], mask1,
                      xs1_b[:, h * OUT:(h + 1) * OUT])
        acc = o if acc is None else acc + o
    z = acc * (1.0 / HEADS) + bias1 + skip1                                    # [N2, OUT]

    # ---- decoder heads: single lane-contiguous store [N2, OUT + N2] ----
    m = jnp.max(z, axis=-1, keepdims=True)
    s = z - m
    logp = s - jnp.log(jnp.sum(jnp.exp(s), axis=-1, keepdims=True))
    prod = lax.dot_general(z, z, (((1,), (1,)), ((), ())),
                           preferred_element_type=f32)                         # z @ z.T
    out_ref[...] = jnp.concatenate([logp, prod], axis=-1)


def _batched_gatnet_call(x, mask0, mask1, w0p, w1p, asrc, biasp):
    """Grid over the subgraph batch ("parallel" -> both TCs on v7x); params resident."""
    cost = pl.CostEstimate(flops=B * 180_000, transcendentals=B * 3_000,
                           bytes_accessed=16_000)
    return pl.pallas_call(
        _gatnet_kernel,
        grid=(B,),
        in_specs=[
            pl.BlockSpec((None, N0, F_IN), lambda b: (b, 0, 0)),   # x
            pl.BlockSpec((None, N1, N0), lambda b: (b, 0, 0)),     # mask0 (bf16)
            pl.BlockSpec((None, N2, N1), lambda b: (b, 0, 0)),     # mask1 (bf16)
            pl.BlockSpec((F_IN, W0_COLS), lambda b: (0, 0)),       # packed layer-0 weights
            pl.BlockSpec((C0, W1_COLS), lambda b: (0, 0)),         # packed layer-1 weights
            pl.BlockSpec((2 * HEADS, C0), lambda b: (0, 0)),       # block-diag att_src (both)
            pl.BlockSpec((1, BIAS_COLS), lambda b: (0, 0)),        # summed biases
        ],
        out_specs=pl.BlockSpec((None, N2, OUT_COLS), lambda b: (b, 0, 0)),
        out_shape=jax.ShapeDtypeStruct((B, N2, OUT_COLS), jnp.float32),
        compiler_params=pltpu.CompilerParams(dimension_semantics=("parallel",)),
        cost_estimate=cost,
    )(x, mask0, mask1, w0p, w1p, asrc, biasp)


# ------------------------------------ host-side prep ------------------------------------
def edge_index_to_mask(edge_index, n_src, n_dst):
    """Dense adjacency mask [n_dst, n_src], mask[i, j]=1 iff edge j->i.
    Matches GATConv add_self_loops=True: drop existing self-loops, add (i,i)."""
    src, dst = edge_index[0], edge_index[1]
    vals = (src != dst).astype(jnp.float32)
    mask = jnp.zeros((n_dst, n_src), jnp.float32).at[dst, src].max(vals)
    n_loop = min(n_dst, n_src)          # NeighborSampler guarantees dst nodes are first srcs
    diag = jnp.arange(n_loop)
    mask = mask.at[diag, diag].set(1.0)
    return mask


def pack_params(p):
    """Pack the 12 PyTorch-layout parameters into 4 VMEM-friendly slabs."""
    def fold_dst(W, att, heads, c):
        # alpha_dst = ((x @ W)_head · att_dst_head)  ==  x @ (W_head @ att_dst_head)
        cols = [W[:, h * c:(h + 1) * c] @ att[0, h * c:(h + 1) * c] for h in range(heads)]
        return jnp.stack(cols, axis=-1)                        # [in, heads]

    def src_blockdiag(att, heads, c):
        rows = [jnp.zeros((heads * c,), jnp.float32).at[h * c:(h + 1) * c]
                .set(att[0, h * c:(h + 1) * c]) for h in range(heads)]
        return jnp.stack(rows, axis=0)                         # [heads, heads*c]

    w0p = jnp.concatenate(
        [p['W0'], p['skipW0'], fold_dst(p['W0'], p['att_dst0'], HEADS, HIDDEN)],
        axis=1).astype(jnp.bfloat16)                           # [F_IN, 68]
    w1p = jnp.concatenate(
        [p['W1'], p['skipW1'], fold_dst(p['W1'], p['att_dst1'], HEADS, OUT)],
        axis=1).astype(jnp.bfloat16)                           # [C0, 44]
    asrc = jnp.concatenate(
        [src_blockdiag(p['att_src0'], HEADS, HIDDEN),
         src_blockdiag(p['att_src1'], HEADS, OUT)], axis=0).astype(jnp.bfloat16)  # [8, 32]
    biasp = jnp.concatenate([p['bias0'] + p['skipb0'],
                             p['bias1'] + p['skipb1']], axis=1)                    # [1, 40]
    return w0p, w1p, asrc, biasp


@jax.jit
def gatnet_forward(x, edge_index0, edge_index1, params):
    """x: [B, N0, F_IN]; edge_index{0,1}: [B, 2, E].  Mask building, param packing and the
    fused kernel all live in one jit so XLA can overlap them (cost_estimate supplied)."""
    mask0 = jax.vmap(lambda e: edge_index_to_mask(e, N0, N1))(edge_index0).astype(jnp.bfloat16)
    mask1 = jax.vmap(lambda e: edge_index_to_mask(e, N1, N2))(edge_index1).astype(jnp.bfloat16)
    # TODO(synk): for large fan-outs, build mask tiles in-kernel from scalar-prefetched edge
    # lists (PrefetchScalarGridSpec) and tile dst rows instead of a dense O(Nd*Ns) mask.
    w0p, w1p, asrc, biasp = pack_params(params)
    out = _batched_gatnet_call(x, mask0, mask1, w0p, w1p, asrc, biasp)
    return out[:, :, :OUT], out[:, :, OUT:]                    # log_softmax(z), z @ z.T


def init_params(key):
    ks = jax.random.split(key, 12)
    s = 0.2
    # PyTorch-layout parameters (1-D params stored as (1, N)); packed in gatnet_forward.
    return dict(
        W0=s * jax.random.normal(ks[0], (F_IN, HEADS * HIDDEN), jnp.float32),
        att_src0=s * jax.random.normal(ks[1], (1, HEADS * HIDDEN), jnp.float32),
        att_dst0=s * jax.random.normal(ks[2], (1, HEADS * HIDDEN), jnp.float32),
        bias0=s * jax.random.normal(ks[3], (1, HEADS * HIDDEN), jnp.float32),
        W1=s * jax.random.normal(ks[4], (HEADS * HIDDEN, HEADS * OUT), jnp.float32),
        att_src1=s * jax.random.normal(ks[5], (1, HEADS * OUT), jnp.float32),
        att_dst1=s * jax.random.normal(ks[6], (1, HEADS * OUT), jnp.float32),
        bias1=s * jax.random.normal(ks[7], (1, OUT), jnp.float32),
        skipW0=s * jax.random.normal(ks[8], (F_IN, HEADS * HIDDEN), jnp.float32),
        skipb0=s * jax.random.normal(ks[9], (1, HEADS * HIDDEN), jnp.float32),
        skipW1=s * jax.random.normal(ks[10], (HEADS * HIDDEN, OUT), jnp.float32),
        skipb1=s * jax.random.normal(ks[11], (1, OUT), jnp.float32),
    )


# --------------------------------------- main ----------------------------------------
if __name__ == "__main__":
    key = jax.random.PRNGKey(0)
    k_x, k_e0, k_e1, k_p = jax.random.split(key, 4)

    # batched node features
    x = jax.random.normal(k_x, (B, N0, F_IN), jnp.float32)

    # sampled bipartite edge_index per layer per subgraph (row0 = src, row1 = dst)
    e0_src = jax.random.randint(jax.random.fold_in(k_e0, 0), (B, 64), 0, N0)
    e0_dst = jax.random.randint(jax.random.fold_in(k_e0, 1), (B, 64), 0, N1)
    e1_src = jax.random.randint(jax.random.fold_in(k_e1, 0), (B, 32), 0, N1)
    e1_dst = jax.random.randint(jax.random.fold_in(k_e1, 1), (B, 32), 0, N2)
    edge_index0 = jnp.stack([e0_src, e0_dst], axis=1)   # [B, 2, 64]
    edge_index1 = jnp.stack([e1_src, e1_dst], axis=1)   # [B, 2, 32]

    params = init_params(k_p)

    logp, x_product = gatnet_forward(x, edge_index0, edge_index1, params)
    jax.block_until_ready((logp, x_product))

    assert logp.shape == (B, N2, OUT)
    assert x_product.shape == (B, N2, N2)
    assert bool(jnp.all(jnp.isfinite(logp))) and bool(jnp.all(jnp.isfinite(x_product)))
    print("KERNEL_OK")
</pallas_src>

<mosaic_0001>
module attributes {stable_mosaic.version = 11 : i64} {
  func.func private @main(%arg0: i32) attributes {dimension_semantics = [#tpu.dimension_semantics<core_parallel>], iteration_bounds = array<i64: 2>, tpu.core_type = #tpu.core_type<sc_scalar_subcore>, window_params = []} {
    return
  }
}

module attributes {stable_mosaic.version = 11 : i64} {
  func.func private @main(%arg0: i32) attributes {dimension_semantics = [#tpu.dimension_semantics<core_parallel>], iteration_bounds = array<i64: 2>, tpu.core_type = #tpu.core_type<sc_scalar_subcore>, window_params = []} {
    return
  }
}

module attributes {stable_mosaic.version = 11 : i64} {
  func.func @_gatnet_kernel(%arg0: i32, %arg1: memref<1x32x16xf32, #tpu.memory_space<vmem>>, %arg2: memref<1x16x32xbf16, #tpu.memory_space<vmem>>, %arg3: memref<1x8x16xbf16, #tpu.memory_space<vmem>>, %arg4: memref<16x68xbf16, #tpu.memory_space<vmem>>, %arg5: memref<32x44xbf16, #tpu.memory_space<vmem>>, %arg6: memref<8x32xbf16, #tpu.memory_space<vmem>>, %arg7: memref<1x40xf32, #tpu.memory_space<vmem>>, %arg8: memref<1x8x16xf32, #tpu.memory_space<vmem>>) attributes {dimension_semantics = [#tpu.dimension_semantics<parallel>], iteration_bounds = array<i64: 2>, scalar_prefetch = 0 : i64, scratch_operands = 0 : i64, tpu.core_type = #tpu.core_type<tc>, window_params = [{transform_indices = @transform_0, window_bounds = array<i64: 1, 32, 16>}, {transform_indices = @transform_1, window_bounds = array<i64: 1, 16, 32>}, {transform_indices = @transform_2, window_bounds = array<i64: 1, 8, 16>}, {pipeline_mode = #tpu.pipeline_mode<synchronous>, transform_indices = @transform_3, window_bounds = array<i64: 16, 68>}, {pipeline_mode = #tpu.pipeline_mode<synchronous>, transform_indices = @transform_4, window_bounds = array<i64: 32, 44>}, {pipeline_mode = #tpu.pipeline_mode<synchronous>, transform_indices = @transform_5, window_bounds = array<i64: 8, 32>}, {pipeline_mode = #tpu.pipeline_mode<synchronous>, transform_indices = @transform_6, window_bounds = array<i64: 1, 40>}, {transform_indices = @transform_7, window_bounds = array<i64: 1, 8, 16>}]} {
    %c0 = arith.constant 0 : index
    %c0_0 = arith.constant 0 : index
    %c0_1 = arith.constant 0 : index
    %0 = vector.load %arg1[%c0, %c0_0, %c0_1] : memref<1x32x16xf32, #tpu.memory_space<vmem>>, vector<1x32x16xf32>
    %1 = vector.shape_cast %0 : vector<1x32x16xf32> to vector<32x16xf32>
    %c0_2 = arith.constant 0 : index
    %c0_3 = arith.constant 0 : index
    %c0_4 = arith.constant 0 : index
    %2 = vector.load %arg2[%c0_2, %c0_3, %c0_4] : memref<1x16x32xbf16, #tpu.memory_space<vmem>>, vector<1x16x32xbf16>
    %3 = vector.shape_cast %2 : vector<1x16x32xbf16> to vector<16x32xbf16>
    %4 = arith.extf %3 : vector<16x32xbf16> to vector<16x32xf32>
    %c0_5 = arith.constant 0 : index
    %c0_6 = arith.constant 0 : index
    %c0_7 = arith.constant 0 : index
    %5 = vector.load %arg3[%c0_5, %c0_6, %c0_7] : memref<1x8x16xbf16, #tpu.memory_space<vmem>>, vector<1x8x16xbf16>
    %6 = vector.shape_cast %5 : vector<1x8x16xbf16> to vector<8x16xbf16>
    %7 = arith.extf %6 : vector<8x16xbf16> to vector<8x16xf32>
    %c0_8 = arith.constant 0 : index
    %c0_9 = arith.constant 0 : index
    %8 = vector.load %arg6[%c0_8, %c0_9] : memref<8x32xbf16, #tpu.memory_space<vmem>>, vector<4x32xbf16>
    %c4 = arith.constant 4 : index
    %c0_10 = arith.constant 0 : index
    %9 = vector.load %arg6[%c4, %c0_10] : memref<8x32xbf16, #tpu.memory_space<vmem>>, vector<4x32xbf16>
    %c0_11 = arith.constant 0 : index
    %c0_12 = arith.constant 0 : index
    %10 = vector.load %arg7[%c0_11, %c0_12] : memref<1x40xf32, #tpu.memory_space<vmem>>, vector<1x32xf32>
    %c0_13 = arith.constant 0 : index
    %c32 = arith.constant 32 : index
    %11 = vector.load %arg7[%c0_13, %c32] : memref<1x40xf32, #tpu.memory_space<vmem>>, vector<1x8xf32>
    %12 = arith.truncf %1 : vector<32x16xf32> to vector<32x16xbf16>
    %c0_14 = arith.constant 0 : index
    %c0_15 = arith.constant 0 : index
    %13 = vector.load %arg4[%c0_14, %c0_15] : memref<16x68xbf16, #tpu.memory_space<vmem>>, vector<16x68xbf16>
    %cst = arith.constant dense<0.000000e+00> : vector<32x68xf32>
    %14 = tpu.matmul %12, %13, %cst {dimension_numbers = #tpu.dot_dimension_numbers<[1], [0], [0], [1], [0, 0, 1, 1], [], []>} : vector<32x16xbf16>, vector<16x68xbf16>, vector<32x68xf32> -> vector<32x68xf32>
    %15 = vector.extract_strided_slice %14 {offsets = [0, 0], sizes = [32, 32], strides = [1, 1]} : vector<32x68xf32> to vector<32x32xf32>
    %16 = vector.extract_strided_slice %14 {offsets = [0, 32], sizes = [16, 32], strides = [1, 1]} : vector<32x68xf32> to vector<16x32xf32>
    %17 = vector.extract_strided_slice %14 {offsets = [0, 64], sizes = [16, 4], strides = [1, 1]} : vector<32x68xf32> to vector<16x4xf32>
    %18 = arith.truncf %15 : vector<32x32xf32> to vector<32x32xbf16>
    %cst_16 = arith.constant dense<0.000000e+00> : vector<4x32xf32>
    %19 = tpu.matmul %8, %18, %cst_16 {dimension_numbers = #tpu.dot_dimension_numbers<[1], [1], [0], [0], [0, 0, 1, 0], [], []>} : vector<4x32xbf16>, vector<32x32xbf16>, vector<4x32xf32> -> vector<4x32xf32>
    %20 = vector.extract_strided_slice %17 {offsets = [0, 0], sizes = [16, 1], strides = [1, 1]} : vector<16x4xf32> to vector<16x1xf32>
    %21 = vector.extract_strided_slice %19 {offsets = [0, 0], sizes = [1, 32], strides = [1, 1]} : vector<4x32xf32> to vector<1x32xf32>
    %22 = vector.extract_strided_slice %18 {offsets = [0, 0], sizes = [32, 8], strides = [1, 1]} : vector<32x32xbf16> to vector<32x8xbf16>
    %23 = vector.broadcast %20 : vector<16x1xf32> to vector<16x32xf32>
    %24 = vector.broadcast %21 : vector<1x32xf32> to vector<16x32xf32>
    %25 = arith.addf %23, %24 : vector<16x32xf32>
    %cst_17 = arith.constant 0.000000e+00 : f32
    %26 = vector.broadcast %cst_17 : f32 to vector<16x32xf32>
    %27 = arith.cmpf ogt, %25, %26 : vector<16x32xf32>
    %cst_18 = arith.constant 2.000000e-01 : f32
    %28 = vector.broadcast %cst_18 : f32 to vector<16x32xf32>
    %29 = arith.mulf %28, %25 : vector<16x32xf32>
    %30 = arith.select %27, %25, %29 : vector<16x32xi1>, vector<16x32xf32>
    %cst_19 = arith.constant 0.000000e+00 : f32
    %31 = vector.broadcast %cst_19 : f32 to vector<16x32xf32>
    %32 = arith.cmpf ogt, %4, %31 : vector<16x32xf32>
    %cst_20 = arith.constant -1.000000e+30 : f32
    %33 = vector.broadcast %cst_20 : f32 to vector<16x32xf32>
    %34 = arith.select %32, %30, %33 : vector<16x32xi1>, vector<16x32xf32>
    %cst_21 = arith.constant dense<0xFF800000> : vector<16xf32>
    %35 = vector.multi_reduction <maximumf>, %34, %cst_21 [1] : vector<16x32xf32> to vector<16xf32>
    %36 = vector.shape_cast %35 : vector<16xf32> to vector<16x1xf32>
    %37 = vector.broadcast %36 : vector<16x1xf32> to vector<16x32xf32>
    %38 = arith.subf %34, %37 : vector<16x32xf32>
    %39 = math.exp %38 : vector<16x32xf32>
    %40 = arith.mulf %39, %4 : vector<16x32xf32>
    %cst_22 = arith.constant dense<0.000000e+00> : vector<16xf32>
    %41 = vector.multi_reduction <add>, %40, %cst_22 [1] : vector<16x32xf32> to vector<16xf32>
    %42 = vector.shape_cast %41 : vector<16xf32> to vector<16x1xf32>
    %cst_23 = arith.constant 1.000000e-16 : f32
    %43 = vector.broadcast %cst_23 : f32 to vector<16x1xf32>
    %44 = arith.addf %42, %43 : vector<16x1xf32>
    %45 = tpu.reciprocal %44 {approx = true} : vector<16x1xf32> -> vector<16x1xf32>
    %46 = vector.broadcast %45 : vector<16x1xf32> to vector<16x32xf32>
    %47 = arith.mulf %40, %46 : vector<16x32xf32>
    %48 = arith.truncf %47 : vector<16x32xf32> to vector<16x32xbf16>
    %cst_24 = arith.constant dense<0.000000e+00> : vector<16x8xf32>
    %49 = tpu.matmul %48, %22, %cst_24 {dimension_numbers = #tpu.dot_dimension_numbers<[1], [0], [0], [1], [0, 0, 1, 1], [], []>} : vector<16x32xbf16>, vector<32x8xbf16>, vector<16x8xf32> -> vector<16x8xf32>
    %50 = vector.extract_strided_slice %17 {offsets = [0, 1], sizes = [16, 1], strides = [1, 1]} : vector<16x4xf32> to vector<16x1xf32>
    %51 = vector.extract_strided_slice %19 {offsets = [1, 0], sizes = [1, 32], strides = [1, 1]} : vector<4x32xf32> to vector<1x32xf32>
    %52 = vector.extract_strided_slice %18 {offsets = [0, 8], sizes = [32, 8], strides = [1, 1]} : vector<32x32xbf16> to vector<32x8xbf16>
    %53 = vector.broadcast %50 : vector<16x1xf32> to vector<16x32xf32>
    %54 = vector.broadcast %51 : vector<1x32xf32> to vector<16x32xf32>
    %55 = arith.addf %53, %54 : vector<16x32xf32>
    %cst_25 = arith.constant 0.000000e+00 : f32
    %56 = vector.broadcast %cst_25 : f32 to vector<16x32xf32>
    %57 = arith.cmpf ogt, %55, %56 : vector<16x32xf32>
    %cst_26 = arith.constant 2.000000e-01 : f32
    %58 = vector.broadcast %cst_26 : f32 to vector<16x32xf32>
    %59 = arith.mulf %58, %55 : vector<16x32xf32>
    %60 = arith.select %57, %55, %59 : vector<16x32xi1>, vector<16x32xf32>
    %cst_27 = arith.constant 0.000000e+00 : f32
    %61 = vector.broadcast %cst_27 : f32 to vector<16x32xf32>
    %62 = arith.cmpf ogt, %4, %61 : vector<16x32xf32>
    %cst_28 = arith.constant -1.000000e+30 : f32
    %63 = vector.broadcast %cst_28 : f32 to vector<16x32xf32>
    %64 = arith.select %62, %60, %63 : vector<16x32xi1>, vector<16x32xf32>
    %cst_29 = arith.constant dense<0xFF800000> : vector<16xf32>
    %65 = vector.multi_reduction <maximumf>, %64, %cst_29 [1] : vector<16x32xf32> to vector<16xf32>
    %66 = vector.shape_cast %65 : vector<16xf32> to vector<16x1xf32>
    %67 = vector.broadcast %66 : vector<16x1xf32> to vector<16x32xf32>
    %68 = arith.subf %64, %67 : vector<16x32xf32>
    %69 = math.exp %68 : vector<16x32xf32>
    %70 = arith.mulf %69, %4 : vector<16x32xf32>
    %cst_30 = arith.constant dense<0.000000e+00> : vector<16xf32>
    %71 = vector.multi_reduction <add>, %70, %cst_30 [1] : vector<16x32xf32> to vector<16xf32>
    %72 = vector.shape_cast %71 : vector<16xf32> to vector<16x1xf32>
    %cst_31 = arith.constant 1.000000e-16 : f32
    %73 = vector.broadcast %cst_31 : f32 to vector<16x1xf32>
    %74 = arith.addf %72, %73 : vector<16x1xf32>
    %75 = tpu.reciprocal %74 {approx = true} : vector<16x1xf32> -> vector<16x1xf32>
    %76 = vector.broadcast %75 : vector<16x1xf32> to vector<16x32xf32>
    %77 = arith.mulf %70, %76 : vector<16x32xf32>
    %78 = arith.truncf %77 : vector<16x32xf32> to vector<16x32xbf16>
    %cst_32 = arith.constant dense<0.000000e+00> : vector<16x8xf32>
    %79 = tpu.matmul %78, %52, %cst_32 {dimension_numbers = #tpu.dot_dimension_numbers<[1], [0], [0], [1], [0, 0, 1, 1], [], []>} : vector<16x32xbf16>, vector<32x8xbf16>, vector<16x8xf32> -> vector<16x8xf32>
    %80 = vector.extract_strided_slice %17 {offsets = [0, 2], sizes = [16, 1], strides = [1, 1]} : vector<16x4xf32> to vector<16x1xf32>
    %81 = vector.extract_strided_slice %19 {offsets = [2, 0], sizes = [1, 32], strides = [1, 1]} : vector<4x32xf32> to vector<1x32xf32>
    %82 = vector.extract_strided_slice %18 {offsets = [0, 16], sizes = [32, 8], strides = [1, 1]} : vector<32x32xbf16> to vector<32x8xbf16>
    %83 = vector.broadcast %80 : vector<16x1xf32> to vector<16x32xf32>
    %84 = vector.broadcast %81 : vector<1x32xf32> to vector<16x32xf32>
    %85 = arith.addf %83, %84 : vector<16x32xf32>
    %cst_33 = arith.constant 0.000000e+00 : f32
    %86 = vector.broadcast %cst_33 : f32 to vector<16x32xf32>
    %87 = arith.cmpf ogt, %85, %86 : vector<16x32xf32>
    %cst_34 = arith.constant 2.000000e-01 : f32
    %88 = vector.broadcast %cst_34 : f32 to vector<16x32xf32>
    %89 = arith.mulf %88, %85 : vector<16x32xf32>
    %90 = arith.select %87, %85, %89 : vector<16x32xi1>, vector<16x32xf32>
    %cst_35 = arith.constant 0.000000e+00 : f32
    %91 = vector.broadcast %cst_35 : f32 to vector<16x32xf32>
    %92 = arith.cmpf ogt, %4, %91 : vector<16x32xf32>
    %cst_36 = arith.constant -1.000000e+30 : f32
    %93 = vector.broadcast %cst_36 : f32 to vector<16x32xf32>
    %94 = arith.select %92, %90, %93 : vector<16x32xi1>, vector<16x32xf32>
    %cst_37 = arith.constant dense<0xFF800000> : vector<16xf32>
    %95 = vector.multi_reduction <maximumf>, %94, %cst_37 [1] : vector<16x32xf32> to vector<16xf32>
    %96 = vector.shape_cast %95 : vector<16xf32> to vector<16x1xf32>
    %97 = vector.broadcast %96 : vector<16x1xf32> to vector<16x32xf32>
    %98 = arith.subf %94, %97 : vector<16x32xf32>
    %99 = math.exp %98 : vector<16x32xf32>
    %100 = arith.mulf %99, %4 : vector<16x32xf32>
    %cst_38 = arith.constant dense<0.000000e+00> : vector<16xf32>
    %101 = vector.multi_reduction <add>, %100, %cst_38 [1] : vector<16x32xf32> to vector<16xf32>
    %102 = vector.shape_cast %101 : vector<16xf32> to vector<16x1xf32>
    %cst_39 = arith.constant 1.000000e-16 : f32
    %103 = vector.broadcast %cst_39 : f32 to vector<16x1xf32>
    %104 = arith.addf %102, %103 : vector<16x1xf32>
    %105 = tpu.reciprocal %104 {approx = true} : vector<16x1xf32> -> vector<16x1xf32>
    %106 = vector.broadcast %105 : vector<16x1xf32> to vector<16x32xf32>
    %107 = arith.mulf %100, %106 : vector<16x32xf32>
    %108 = arith.truncf %107 : vector<16x32xf32> to vector<16x32xbf16>
    %cst_40 = arith.constant dense<0.000000e+00> : vector<16x8xf32>
    %109 = tpu.matmul %108, %82, %cst_40 {dimension_numbers = #tpu.dot_dimension_numbers<[1], [0], [0], [1], [0, 0, 1, 1], [], []>} : vector<16x32xbf16>, vector<32x8xbf16>, vector<16x8xf32> -> vector<16x8xf32>
    %110 = vector.extract_strided_slice %17 {offsets = [0, 3], sizes = [16, 1], strides = [1, 1]} : vector<16x4xf32> to vector<16x1xf32>
    %111 = vector.extract_strided_slice %19 {offsets = [3, 0], sizes = [1, 32], strides = [1, 1]} : vector<4x32xf32> to vector<1x32xf32>
    %112 = vector.extract_strided_slice %18 {offsets = [0, 24], sizes = [32, 8], strides = [1, 1]} : vector<32x32xbf16> to vector<32x8xbf16>
    %113 = vector.broadcast %110 : vector<16x1xf32> to vector<16x32xf32>
    %114 = vector.broadcast %111 : vector<1x32xf32> to vector<16x32xf32>
    %115 = arith.addf %113, %114 : vector<16x32xf32>
    %cst_41 = arith.constant 0.000000e+00 : f32
    %116 = vector.broadcast %cst_41 : f32 to vector<16x32xf32>
    %117 = arith.cmpf ogt, %115, %116 : vector<16x32xf32>
    %cst_42 = arith.constant 2.000000e-01 : f32
    %118 = vector.broadcast %cst_42 : f32 to vector<16x32xf32>
    %119 = arith.mulf %118, %115 : vector<16x32xf32>
    %120 = arith.select %117, %115, %119 : vector<16x32xi1>, vector<16x32xf32>
    %cst_43 = arith.constant 0.000000e+00 : f32
    %121 = vector.broadcast %cst_43 : f32 to vector<16x32xf32>
    %122 = arith.cmpf ogt, %4, %121 : vector<16x32xf32>
    %cst_44 = arith.constant -1.000000e+30 : f32
    %123 = vector.broadcast %cst_44 : f32 to vector<16x32xf32>
    %124 = arith.select %122, %120, %123 : vector<16x32xi1>, vector<16x32xf32>
    %cst_45 = arith.constant dense<0xFF800000> : vector<16xf32>
    %125 = vector.multi_reduction <maximumf>, %124, %cst_45 [1] : vector<16x32xf32> to vector<16xf32>
    %126 = vector.shape_cast %125 : vector<16xf32> to vector<16x1xf32>
    %127 = vector.broadcast %126 : vector<16x1xf32> to vector<16x32xf32>
    %128 = arith.subf %124, %127 : vector<16x32xf32>
    %129 = math.exp %128 : vector<16x32xf32>
    %130 = arith.mulf %129, %4 : vector<16x32xf32>
    %cst_46 = arith.constant dense<0.000000e+00> : vector<16xf32>
    %131 = vector.multi_reduction <add>, %130, %cst_46 [1] : vector<16x32xf32> to vector<16xf32>
    %132 = vector.shape_cast %131 : vector<16xf32> to vector<16x1xf32>
    %cst_47 = arith.constant 1.000000e-16 : f32
    %133 = vector.broadcast %cst_47 : f32 to vector<16x1xf32>
    %134 = arith.addf %132, %133 : vector<16x1xf32>
    %135 = tpu.reciprocal %134 {approx = true} : vector<16x1xf32> -> vector<16x1xf32>
    %136 = vector.broadcast %135 : vector<16x1xf32> to vector<16x32xf32>
    %137 = arith.mulf %130, %136 : vector<16x32xf32>
    %138 = arith.truncf %137 : vector<16x32xf32> to vector<16x32xbf16>
    %cst_48 = arith.constant dense<0.000000e+00> : vector<16x8xf32>
    %139 = tpu.matmul %138, %112, %cst_48 {dimension_numbers = #tpu.dot_dimension_numbers<[1], [0], [0], [1], [0, 0, 1, 1], [], []>} : vector<16x32xbf16>, vector<32x8xbf16>, vector<16x8xf32> -> vector<16x8xf32>
    %140 = tpu.concatenate %49, %79, %109, %139 in 1 : vector<16x8xf32>, vector<16x8xf32>, vector<16x8xf32>, vector<16x8xf32> -> vector<16x32xf32>
    %141 = arith.addf %140, %16 : vector<16x32xf32>
    %142 = vector.broadcast %10 : vector<1x32xf32> to vector<16x32xf32>
    %143 = arith.addf %141, %142 : vector<16x32xf32>
    %cst_49 = arith.constant 0.000000e+00 : f32
    %144 = vector.broadcast %cst_49 : f32 to vector<16x32xf32>
    %145 = arith.cmpf ogt, %143, %144 : vector<16x32xf32>
    %cst_50 = arith.constant 0.000000e+00 : f32
    %146 = vector.broadcast %cst_50 : f32 to vector<16x32xf32>
    %147 = arith.minimumf %143, %146 : vector<16x32xf32>
    %148 = math.exp %147 : vector<16x32xf32>
    %cst_51 = arith.constant 1.000000e+00 : f32
    %149 = vector.broadcast %cst_51 : f32 to vector<16x32xf32>
    %150 = arith.subf %148, %149 : vector<16x32xf32>
    %151 = arith.select %145, %143, %150 : vector<16x32xi1>, vector<16x32xf32>
    %152 = arith.truncf %151 : vector<16x32xf32> to vector<16x32xbf16>
    %c0_52 = arith.constant 0 : index
    %c0_53 = arith.constant 0 : index
    %153 = vector.load %arg5[%c0_52, %c0_53] : memref<32x44xbf16, #tpu.memory_space<vmem>>, vector<32x44xbf16>
    %cst_54 = arith.constant dense<0.000000e+00> : vector<16x44xf32>
    %154 = tpu.matmul %152, %153, %cst_54 {dimension_numbers = #tpu.dot_dimension_numbers<[1], [0], [0], [1], [0, 0, 1, 1], [], []>} : vector<16x32xbf16>, vector<32x44xbf16>, vector<16x44xf32> -> vector<16x44xf32>
    %155 = vector.extract_strided_slice %154 {offsets = [0, 0], sizes = [16, 32], strides = [1, 1]} : vector<16x44xf32> to vector<16x32xf32>
    %156 = vector.extract_strided_slice %154 {offsets = [0, 32], sizes = [8, 8], strides = [1, 1]} : vector<16x44xf32> to vector<8x8xf32>
    %157 = vector.extract_strided_slice %154 {offsets = [0, 40], sizes = [8, 4], strides = [1, 1]} : vector<16x44xf32> to vector<8x4xf32>
    %158 = arith.truncf %155 : vector<16x32xf32> to vector<16x32xbf16>
    %cst_55 = arith.constant dense<0.000000e+00> : vector<4x16xf32>
    %159 = tpu.matmul %9, %158, %cst_55 {dimension_numbers = #tpu.dot_dimension_numbers<[1], [1], [0], [0], [0, 0, 1, 0], [], []>} : vector<4x32xbf16>, vector<16x32xbf16>, vector<4x16xf32> -> vector<4x16xf32>
    %160 = vector.extract_strided_slice %157 {offsets = [0, 0], sizes = [8, 1], strides = [1, 1]} : vector<8x4xf32> to vector<8x1xf32>
    %161 = vector.extract_strided_slice %159 {offsets = [0, 0], sizes = [1, 16], strides = [1, 1]} : vector<4x16xf32> to vector<1x16xf32>
    %162 = vector.extract_strided_slice %158 {offsets = [0, 0], sizes = [16, 8], strides = [1, 1]} : vector<16x32xbf16> to vector<16x8xbf16>
    %163 = vector.broadcast %160 : vector<8x1xf32> to vector<8x16xf32>
    %164 = vector.broadcast %161 : vector<1x16xf32> to vector<8x16xf32>
    %165 = arith.addf %163, %164 : vector<8x16xf32>
    %cst_56 = arith.constant 0.000000e+00 : f32
    %166 = vector.broadcast %cst_56 : f32 to vector<8x16xf32>
    %167 = arith.cmpf ogt, %165, %166 : vector<8x16xf32>
    %cst_57 = arith.constant 2.000000e-01 : f32
    %168 = vector.broadcast %cst_57 : f32 to vector<8x16xf32>
    %169 = arith.mulf %168, %165 : vector<8x16xf32>
    %170 = arith.select %167, %165, %169 : vector<8x16xi1>, vector<8x16xf32>
    %cst_58 = arith.constant 0.000000e+00 : f32
    %171 = vector.broadcast %cst_58 : f32 to vector<8x16xf32>
    %172 = arith.cmpf ogt, %7, %171 : vector<8x16xf32>
    %cst_59 = arith.constant -1.000000e+30 : f32
    %173 = vector.broadcast %cst_59 : f32 to vector<8x16xf32>
    %174 = arith.select %172, %170, %173 : vector<8x16xi1>, vector<8x16xf32>
    %cst_60 = arith.constant dense<0xFF800000> : vector<8xf32>
    %175 = vector.multi_reduction <maximumf>, %174, %cst_60 [1] : vector<8x16xf32> to vector<8xf32>
    %176 = vector.shape_cast %175 : vector<8xf32> to vector<8x1xf32>
    %177 = vector.broadcast %176 : vector<8x1xf32> to vector<8x16xf32>
    %178 = arith.subf %174, %177 : vector<8x16xf32>
    %179 = math.exp %178 : vector<8x16xf32>
    %180 = arith.mulf %179, %7 : vector<8x16xf32>
    %cst_61 = arith.constant dense<0.000000e+00> : vector<8xf32>
    %181 = vector.multi_reduction <add>, %180, %cst_61 [1] : vector<8x16xf32> to vector<8xf32>
    %182 = vector.shape_cast %181 : vector<8xf32> to vector<8x1xf32>
    %cst_62 = arith.constant 1.000000e-16 : f32
    %183 = vector.broadcast %cst_62 : f32 to vector<8x1xf32>
    %184 = arith.addf %182, %183 : vector<8x1xf32>
    %185 = tpu.reciprocal %184 {approx = true} : vector<8x1xf32> -> vector<8x1xf32>
    %186 = vector.broadcast %185 : vector<8x1xf32> to vector<8x16xf32>
    %187 = arith.mulf %180, %186 : vector<8x16xf32>
    %188 = arith.truncf %187 : vector<8x16xf32> to vector<8x16xbf16>
    %cst_63 = arith.constant dense<0.000000e+00> : vector<8x8xf32>
    %189 = tpu.matmul %188, %162, %cst_63 {dimension_numbers = #tpu.dot_dimension_numbers<[1], [0], [0], [1], [0, 0, 1, 1], [], []>} : vector<8x16xbf16>, vector<16x8xbf16>, vector<8x8xf32> -> vector<8x8xf32>
    %190 = vector.extract_strided_slice %157 {offsets = [0, 1], sizes = [8, 1], strides = [1, 1]} : vector<8x4xf32> to vector<8x1xf32>
    %191 = vector.extract_strided_slice %159 {offsets = [1, 0], sizes = [1, 16], strides = [1, 1]} : vector<4x16xf32> to vector<1x16xf32>
    %192 = vector.extract_strided_slice %158 {offsets = [0, 8], sizes = [16, 8], strides = [1, 1]} : vector<16x32xbf16> to vector<16x8xbf16>
    %193 = vector.broadcast %190 : vector<8x1xf32> to vector<8x16xf32>
    %194 = vector.broadcast %191 : vector<1x16xf32> to vector<8x16xf32>
    %195 = arith.addf %193, %194 : vector<8x16xf32>
    %cst_64 = arith.constant 0.000000e+00 : f32
    %196 = vector.broadcast %cst_64 : f32 to vector<8x16xf32>
    %197 = arith.cmpf ogt, %195, %196 : vector<8x16xf32>
    %cst_65 = arith.constant 2.000000e-01 : f32
    %198 = vector.broadcast %cst_65 : f32 to vector<8x16xf32>
    %199 = arith.mulf %198, %195 : vector<8x16xf32>
    %200 = arith.select %197, %195, %199 : vector<8x16xi1>, vector<8x16xf32>
    %cst_66 = arith.constant 0.000000e+00 : f32
    %201 = vector.broadcast %cst_66 : f32 to vector<8x16xf32>
    %202 = arith.cmpf ogt, %7, %201 : vector<8x16xf32>
    %cst_67 = arith.constant -1.000000e+30 : f32
    %203 = vector.broadcast %cst_67 : f32 to vector<8x16xf32>
    %204 = arith.select %202, %200, %203 : vector<8x16xi1>, vector<8x16xf32>
    %cst_68 = arith.constant dense<0xFF800000> : vector<8xf32>
    %205 = vector.multi_reduction <maximumf>, %204, %cst_68 [1] : vector<8x16xf32> to vector<8xf32>
    %206 = vector.shape_cast %205 : vector<8xf32> to vector<8x1xf32>
    %207 = vector.broadcast %206 : vector<8x1xf32> to vector<8x16xf32>
    %208 = arith.subf %204, %207 : vector<8x16xf32>
    %209 = math.exp %208 : vector<8x16xf32>
    %210 = arith.mulf %209, %7 : vector<8x16xf32>
    %cst_69 = arith.constant dense<0.000000e+00> : vector<8xf32>
    %211 = vector.multi_reduction <add>, %210, %cst_69 [1] : vector<8x16xf32> to vector<8xf32>
    %212 = vector.shape_cast %211 : vector<8xf32> to vector<8x1xf32>
    %cst_70 = arith.constant 1.000000e-16 : f32
    %213 = vector.broadcast %cst_70 : f32 to vector<8x1xf32>
    %214 = arith.addf %212, %213 : vector<8x1xf32>
    %215 = tpu.reciprocal %214 {approx = true} : vector<8x1xf32> -> vector<8x1xf32>
    %216 = vector.broadcast %215 : vector<8x1xf32> to vector<8x16xf32>
    %217 = arith.mulf %210, %216 : vector<8x16xf32>
    %218 = arith.truncf %217 : vector<8x16xf32> to vector<8x16xbf16>
    %cst_71 = arith.constant dense<0.000000e+00> : vector<8x8xf32>
    %219 = tpu.matmul %218, %192, %cst_71 {dimension_numbers = #tpu.dot_dimension_numbers<[1], [0], [0], [1], [0, 0, 1, 1], [], []>} : vector<8x16xbf16>, vector<16x8xbf16>, vector<8x8xf32> -> vector<8x8xf32>
    %220 = arith.addf %189, %219 : vector<8x8xf32>
    %221 = vector.extract_strided_slice %157 {offsets = [0, 2], sizes = [8, 1], strides = [1, 1]} : vector<8x4xf32> to vector<8x1xf32>
    %222 = vector.extract_strided_slice %159 {offsets = [2, 0], sizes = [1, 16], strides = [1, 1]} : vector<4x16xf32> to vector<1x16xf32>
    %223 = vector.extract_strided_slice %158 {offsets = [0, 16], sizes = [16, 8], strides = [1, 1]} : vector<16x32xbf16> to vector<16x8xbf16>
    %224 = vector.broadcast %221 : vector<8x1xf32> to vector<8x16xf32>
    %225 = vector.broadcast %222 : vector<1x16xf32> to vector<8x16xf32>
    %226 = arith.addf %224, %225 : vector<8x16xf32>
    %cst_72 = arith.constant 0.000000e+00 : f32
    %227 = vector.broadcast %cst_72 : f32 to vector<8x16xf32>
    %228 = arith.cmpf ogt, %226, %227 : vector<8x16xf32>
    %cst_73 = arith.constant 2.000000e-01 : f32
    %229 = vector.broadcast %cst_73 : f32 to vector<8x16xf32>
    %230 = arith.mulf %229, %226 : vector<8x16xf32>
    %231 = arith.select %228, %226, %230 : vector<8x16xi1>, vector<8x16xf32>
    %cst_74 = arith.constant 0.000000e+00 : f32
    %232 = vector.broadcast %cst_74 : f32 to vector<8x16xf32>
    %233 = arith.cmpf ogt, %7, %232 : vector<8x16xf32>
    %cst_75 = arith.constant -1.000000e+30 : f32
    %234 = vector.broadcast %cst_75 : f32 to vector<8x16xf32>
    %235 = arith.select %233, %231, %234 : vector<8x16xi1>, vector<8x16xf32>
    %cst_76 = arith.constant dense<0xFF800000> : vector<8xf32>
    %236 = vector.multi_reduction <maximumf>, %235, %cst_76 [1] : vector<8x16xf32> to vector<8xf32>
    %237 = vector.shape_cast %236 : vector<8xf32> to vector<8x1xf32>
    %238 = vector.broadcast %237 : vector<8x1xf32> to vector<8x16xf32>
    %239 = arith.subf %235, %238 : vector<8x16xf32>
    %240 = math.exp %239 : vector<8x16xf32>
    %241 = arith.mulf %240, %7 : vector<8x16xf32>
    %cst_77 = arith.constant dense<0.000000e+00> : vector<8xf32>
    %242 = vector.multi_reduction <add>, %241, %cst_77 [1] : vector<8x16xf32> to vector<8xf32>
    %243 = vector.shape_cast %242 : vector<8xf32> to vector<8x1xf32>
    %cst_78 = arith.constant 1.000000e-16 : f32
    %244 = vector.broadcast %cst_78 : f32 to vector<8x1xf32>
    %245 = arith.addf %243, %244 : vector<8x1xf32>
    %246 = tpu.reciprocal %245 {approx = true} : vector<8x1xf32> -> vector<8x1xf32>
    %247 = vector.broadcast %246 : vector<8x1xf32> to vector<8x16xf32>
    %248 = arith.mulf %241, %247 : vector<8x16xf32>
    %249 = arith.truncf %248 : vector<8x16xf32> to vector<8x16xbf16>
    %cst_79 = arith.constant dense<0.000000e+00> : vector<8x8xf32>
    %250 = tpu.matmul %249, %223, %cst_79 {dimension_numbers = #tpu.dot_dimension_numbers<[1], [0], [0], [1], [0, 0, 1, 1], [], []>} : vector<8x16xbf16>, vector<16x8xbf16>, vector<8x8xf32> -> vector<8x8xf32>
    %251 = arith.addf %220, %250 : vector<8x8xf32>
    %252 = vector.extract_strided_slice %157 {offsets = [0, 3], sizes = [8, 1], strides = [1, 1]} : vector<8x4xf32> to vector<8x1xf32>
    %253 = vector.extract_strided_slice %159 {offsets = [3, 0], sizes = [1, 16], strides = [1, 1]} : vector<4x16xf32> to vector<1x16xf32>
    %254 = vector.extract_strided_slice %158 {offsets = [0, 24], sizes = [16, 8], strides = [1, 1]} : vector<16x32xbf16> to vector<16x8xbf16>
    %255 = vector.broadcast %252 : vector<8x1xf32> to vector<8x16xf32>
    %256 = vector.broadcast %253 : vector<1x16xf32> to vector<8x16xf32>
    %257 = arith.addf %255, %256 : vector<8x16xf32>
    %cst_80 = arith.constant 0.000000e+00 : f32
    %258 = vector.broadcast %cst_80 : f32 to vector<8x16xf32>
    %259 = arith.cmpf ogt, %257, %258 : vector<8x16xf32>
    %cst_81 = arith.constant 2.000000e-01 : f32
    %260 = vector.broadcast %cst_81 : f32 to vector<8x16xf32>
    %261 = arith.mulf %260, %257 : vector<8x16xf32>
    %262 = arith.select %259, %257, %261 : vector<8x16xi1>, vector<8x16xf32>
    %cst_82 = arith.constant 0.000000e+00 : f32
    %263 = vector.broadcast %cst_82 : f32 to vector<8x16xf32>
    %264 = arith.cmpf ogt, %7, %263 : vector<8x16xf32>
    %cst_83 = arith.constant -1.000000e+30 : f32
    %265 = vector.broadcast %cst_83 : f32 to vector<8x16xf32>
    %266 = arith.select %264, %262, %265 : vector<8x16xi1>, vector<8x16xf32>
    %cst_84 = arith.constant dense<0xFF800000> : vector<8xf32>
    %267 = vector.multi_reduction <maximumf>, %266, %cst_84 [1] : vector<8x16xf32> to vector<8xf32>
    %268 = vector.shape_cast %267 : vector<8xf32> to vector<8x1xf32>
    %269 = vector.broadcast %268 : vector<8x1xf32> to vector<8x16xf32>
    %270 = arith.subf %266, %269 : vector<8x16xf32>
    %271 = math.exp %270 : vector<8x16xf32>
    %272 = arith.mulf %271, %7 : vector<8x16xf32>
    %cst_85 = arith.constant dense<0.000000e+00> : vector<8xf32>
    %273 = vector.multi_reduction <add>, %272, %cst_85 [1] : vector<8x16xf32> to vector<8xf32>
    %274 = vector.shape_cast %273 : vector<8xf32> to vector<8x1xf32>
    %cst_86 = arith.constant 1.000000e-16 : f32
    %275 = vector.broadcast %cst_86 : f32 to vector<8x1xf32>
    %276 = arith.addf %274, %275 : vector<8x1xf32>
    %277 = tpu.reciprocal %276 {approx = true} : vector<8x1xf32> -> vector<8x1xf32>
    %278 = vector.broadcast %277 : vector<8x1xf32> to vector<8x16xf32>
    %279 = arith.mulf %272, %278 : vector<8x16xf32>
    %280 = arith.truncf %279 : vector<8x16xf32> to vector<8x16xbf16>
    %cst_87 = arith.constant dense<0.000000e+00> : vector<8x8xf32>
    %281 = tpu.matmul %280, %254, %cst_87 {dimension_numbers = #tpu.dot_dimension_numbers<[1], [0], [0], [1], [0, 0, 1, 1], [], []>} : vector<8x16xbf16>, vector<16x8xbf16>, vector<8x8xf32> -> vector<8x8xf32>
    %282 = arith.addf %251, %281 : vector<8x8xf32>
    %cst_88 = arith.constant 2.500000e-01 : f32
    %283 = vector.broadcast %cst_88 : f32 to vector<8x8xf32>
    %284 = arith.mulf %282, %283 : vector<8x8xf32>
    %285 = vector.broadcast %11 : vector<1x8xf32> to vector<8x8xf32>
    %286 = arith.addf %284, %285 : vector<8x8xf32>
    %287 = arith.addf %286, %156 : vector<8x8xf32>
    %cst_89 = arith.constant dense<0xFF800000> : vector<8xf32>
    %288 = vector.multi_reduction <maximumf>, %287, %cst_89 [1] : vector<8x8xf32> to vector<8xf32>
    %289 = vector.shape_cast %288 : vector<8xf32> to vector<8x1xf32>
    %290 = vector.broadcast %289 : vector<8x1xf32> to vector<8x8xf32>
    %291 = arith.subf %287, %290 : vector<8x8xf32>
    %292 = math.exp %291 : vector<8x8xf32>
    %cst_90 = arith.constant dense<0.000000e+00> : vector<8xf32>
    %293 = vector.multi_reduction <add>, %292, %cst_90 [1] : vector<8x8xf32> to vector<8xf32>
    %294 = vector.shape_cast %293 : vector<8xf32> to vector<8x1xf32>
    %295 = math.log %294 : vector<8x1xf32>
    %296 = vector.broadcast %295 : vector<8x1xf32> to vector<8x8xf32>
    %297 = arith.subf %291, %296 : vector<8x8xf32>
    %cst_91 = arith.constant dense<0.000000e+00> : vector<8x8xf32>
    %298 = tpu.matmul %287, %287, %cst_91 {dimension_numbers = #tpu.dot_dimension_numbers<[1], [1], [0], [0], [0, 0, 1, 0], [], []>} : vector<8x8xf32>, vector<8x8xf32>, vector<8x8xf32> -> vector<8x8xf32>
    %299 = tpu.concatenate %297, %298 in 1 : vector<8x8xf32>, vector<8x8xf32> -> vector<8x16xf32>
    %c0_92 = arith.constant 0 : index
    %c0_93 = arith.constant 0 : index
    %c0_94 = arith.constant 0 : index
    %300 = vector.load %arg8[%c0_92, %c0_93, %c0_94] : memref<1x8x16xf32, #tpu.memory_space<vmem>>, vector<1x8x16xf32>
    %301 = vector.shape_cast %300 : vector<1x8x16xf32> to vector<8x16xf32>
    %302 = vector.shape_cast %299 : vector<8x16xf32> to vector<1x8x16xf32>
    tpu.vector_store %arg8[%c0_92, %c0_93, %c0_94], %302 {strides = array<i32>} : memref<1x8x16xf32, #tpu.memory_space<vmem>>, vector<1x8x16xf32>,
    return
  }
  func.func @transform_0(%arg0: i32) -> (i32, i32, i32) {
    %c0_i32 = arith.constant 0 : i32
    %c0_i32_0 = arith.constant 0 : i32
    %c0_i32_1 = arith.constant 0 : i32
    return %arg0, %c0_i32, %c0_i32_0 : i32, i32, i32
  }
  func.func @transform_1(%arg0: i32) -> (i32, i32, i32) {
    %c0_i32 = arith.constant 0 : i32
    %c0_i32_0 = arith.constant 0 : i32
    %c0_i32_1 = arith.constant 0 : i32
    return %arg0, %c0_i32, %c0_i32_0 : i32, i32, i32
  }
  func.func @transform_2(%arg0: i32) -> (i32, i32, i32) {
    %c0_i32 = arith.constant 0 : i32
    %c0_i32_0 = arith.constant 0 : i32
    %c0_i32_1 = arith.constant 0 : i32
    return %arg0, %c0_i32, %c0_i32_0 : i32, i32, i32
  }
  func.func @transform_3(%arg0: i32) -> (i32, i32) {
    %c0_i32 = arith.constant 0 : i32
    %c0_i32_0 = arith.constant 0 : i32
    %c0_i32_1 = arith.constant 0 : i32
    return %c0_i32, %c0_i32_0 : i32, i32
  }
  func.func @transform_4(%arg0: i32) -> (i32, i32) {
    %c0_i32 = arith.constant 0 : i32
    %c0_i32_0 = arith.constant 0 : i32
    %c0_i32_1 = arith.constant 0 : i32
    return %c0_i32, %c0_i32_0 : i32, i32
  }
  func.func @transform_5(%arg0: i32) -> (i32, i32) {
    %c0_i32 = arith.constant 0 : i32
    %c0_i32_0 = arith.constant 0 : i32
    %c0_i32_1 = arith.constant 0 : i32
    return %c0_i32, %c0_i32_0 : i32, i32
  }
  func.func @transform_6(%arg0: i32) -> (i32, i32) {
    %c0_i32 = arith.constant 0 : i32
    %c0_i32_0 = arith.constant 0 : i32
    %c0_i32_1 = arith.constant 0 : i32
    return %c0_i32, %c0_i32_0 : i32, i32
  }
  func.func @transform_7(%arg0: i32) -> (i32, i32, i32) {
    %c0_i32 = arith.constant 0 : i32
    %c0_i32_0 = arith.constant 0 : i32
    %c0_i32_1 = arith.constant 0 : i32
    return %arg0, %c0_i32, %c0_i32_0 : i32, i32, i32
  }
}

</mosaic_0001>

<bundles_post_ra>
// kernel: gatnet_forward.1
= control target key start
LH: loop header
LB: loop body
LE: loop exit
PB: predicated region body
PF: predicated region fallthrough
CT: control target
= control target key end

     0   :  { %s1820_s24 = smov 0   ;;  %s2114_s0 = inlined_call_operand.vmem [shape: f32[2,32,16], index: 0, kind: input, shape index: {}]   ;;  %s2115_s1 = inlined_call_operand.vmem [shape: bf16[2,16,32], index: 1, kind: input, shape index: {}]   ;;  %s2116_s2 = inlined_call_operand.vmem [shape: bf16[2,8,16], index: 2, kind: input, shape index: {}]   ;;  %s2117_s3 = inlined_call_operand.vmem [shape: bf16[16,68], index: 3, kind: input, shape index: {}]   ;;  %s2118_s4 = inlined_call_operand.vmem [shape: bf16[32,44], index: 4, kind: input, shape index: {}]   ;;  %s2119_s5 = inlined_call_operand.vmem [shape: bf16[8,32], index: 5, kind: input, shape index: {}]   ;;  %s2120_s6 = inlined_call_operand.vmem [shape: f32[1,40], index: 6, kind: input, shape index: {}]   ;;  %s2121_s7 = inlined_call_operand.vmem [shape: f32[2,8,16], index: 7, kind: output, shape index: {}]  }
   0x1 LB: > { %s1485_s25 = sadd.s32 4294967295, %s1761_s24   ;;  %p1489_p0 = scmp.ge.s32.totalorder %s1761_s24, 1  ;;  %s1761_s24 = sphi %s1820_s24, %s17_s24  }
   0x2   : > { %p256_p1 = scmp.lt.s32.totalorder %s1761_s24, 3 }
   0x4   : > { %p257_p2 = pnand %p1489_p0, %p256_p1 }
   0x5   : > { %v1695_v0 = vld [vmem:[%s2117_s3] sm:$0xff] (!%p257_p2)   ;;  %p296_p3 = scmp.lt.s32.totalorder (!%p257_p2), %s1485_s25, 1  ;;  %vm338_vm0 = vcmask (!%p257_p2), 130048   ;;  %v1763_v7 = vmov (!%p257_p2), 65   ;;  %v1764_v8 = vmov (!%p257_p2), 64   ;;  %v1765_v9 = vmov (!%p257_p2), 0.0  }
   0x6   : > { %260 = sbr.rel (%p257_p2) target bundleno = 2519 (0x9d7), region = 48  ;;  %1559 = vmatprep.subr.bf16.mxu1 (!%p257_p2), %v1695_v0  ;;  %1686 = vset.pattern.permute.xlu1 (!%p257_p2), %v1763_v7  ;;  %vm1766_vm1 = vmmov (!%p257_p2), 0   ;;  %vm396_vm2 = vcmask (!%p257_p2), 261120   ;;  %v1767_v17 = vmov (!%p257_p2), 66   ;;  %v1768_v18 = vmov (!%p257_p2), 67   ;;  %s1769_s15 = smov (!%p257_p2), 120  }
   0x7   : > { %1560 = vmatpush3.bf16.msra.mxu1 (!%p257_p2), %v1695_v0  ;;  %1685 = vset.pattern.permute.xlu0 (!%p257_p2), %v1764_v8  ;;  %v325_v20 = vld [vmem:[%s2119_s5] sm:$0x3] (!%p257_p2)  ;;  %v456_v23 = vlaneseq (!%p257_p2)  ;;  %s1770_s16 = smov (!%p257_p2), 112   ;;  %s1771_s17 = smov (!%p257_p2), 104   ;;  %vm866_vm13 = vcmask (!%p257_p2), 64512   ;;  %vm871_vm14 = vcmask (!%p257_p2), 195584  }
   0x8   : > { %1565 = vmatprep.subr.bf16.mxu0 (!%p257_p2), %v1765_v9  ;;  %1589 = vmatprep.subr.bf16.mxu1 (!%p257_p2), %v1765_v9  ;;  %s1772_s18 = smov (!%p257_p2), 16   ;;  %s1773_s19 = smov (!%p257_p2), 8  }
   0x9   : > { %1569 = vmatprep.mubr.msk.bf16.mxu0 (!%p257_p2), %vm1766_vm1, %v1765_v9  ;;  %v1885_v26 = vshrl.u32 (!%p257_p2), %v456_v23, 7  ;;  %s1774_s20 = smov (!%p257_p2), 24   ;;  %s1775_s21 = smov (!%p257_p2), 96  }
   0xb   : > { %v458_v30 = vsub.s32 (!%p257_p2), 0, %v1885_v26  ;;  %v553_v31 = vsub.s32 (!%p257_p2), 1, %v1885_v26  ;;  %v654_v32 = vsub.s32 (!%p257_p2), 2, %v1885_v26  ;;  %v753_v33 = vsub.s32 (!%p257_p2), 3, %v1885_v26 }
   0xd   : > { %s2123_s25 = smov (!%p296_p3, %s1485_s25), 1 }
   0xe   : > { %s1520_s28 = sshll.u32 %s2123_s25, 5  ;;  %s1521_s11 = sshll.u32 %s2123_s25, 3 }
   0xf   : > { %s300_s8 = scalar_lea.vmem %s2114_s0, %s1520_s28  ;;  %s305_s14 = scalar_lea.vmem %s2115_s1, %s1521_s11 }
  0x10   : > { %v315_v1 = vld [vmem:[%s300_s8] sm:$0xff]  ;;  %v316_v2 = vld [vmem:[%s300_s8 + $0x8] sm:$0xff]  ;;  %v317_v4 = vld [vmem:[%s300_s8 + $0x10] sm:$0xff]  ;;  %s1494_s9 = sshll.u32 %s2123_s25, 2 }
  0x11   : > { %v328_v3 = vpack.c.bf16 %v316_v2, %v315_v1  ;;  %v318_v5 = vld [vmem:[%s300_s8 + $0x18] sm:$0xff]  ;;  %v1523_v27 = vld [vmem:[%s305_s14] sm:$0xff]   ;;  %s309_s13 = scalar_lea.vmem %s2116_s2, %s1494_s9 }
  0x12   : > { %v329_v6 = vpack.c.bf16 %v318_v5, %v317_v4  ;;  %v1891_v34 = vunpack.c.h.bf16 %v1523_v27  ;;  %v1893_v35 = vunpack.c.l.bf16 %v1523_v27 }
  0x13   : > { %1561 = vmatprep.mubr.msk.bf16.mxu1 %vm338_vm0, %v328_v3 }
  0x14   : > { %1562 = vmatmul.mubr.msk.bf16.vlgmr.msra.gmra.mrb[0].mxu1 %vm338_vm0, %v329_v6  ;;  %vm469_vm3 = vcmp.gt.f32.partialorder %v1891_v34, 0.0  ;;  %vm468_vm4 = vcmp.gt.f32.partialorder %v1893_v35, 0.0 }
  0x15   : > { %1593 = vmatprep.mubr.msk.bf16.mxu1 %vm1766_vm1, %v1765_v9 }
  0xe7   : > { %v1563_v10 = vpop.f32.mrb[0].mxu1 }
  0xe8   : > { %v1845_v11 = vpop.f32.mrb[1].mxu1 }
  0xe9   : > { %544 = vperm.xlu1 %1686, %v1845_v11   ;;  %448 = vperm.xlu0 %1685, %v1845_v11   ;;  %v1564_v12 = vpop.f32.mrb[2].mxu1 }
  0xea   : > { %v1849_v13 = vpack.c.bf16 %v1564_v12, %v1563_v10  ;;  %v1851_v14 = vpop.f32.mrb[3].mxu1 }
  0xeb   : > { %v1855_v15 = vpack.c.bf16 %v1851_v14, %v1845_v11 }
  0xec   : > { %v404_v19 = vsel %vm396_vm2, %v1849_v13, 0 }
  0xed   : > { %548 = vperm.xlu1 %1686, %v1851_v14   ;;  %453 = vperm.xlu0 %1685, %v1851_v14   ;;  %v401_v16 = vsel %vm396_vm2, %v1855_v15, 0 }
  0xee   : > { %1566 = vmatpush3.bf16.xpose.msra.mxu0 %v401_v16 }
  0xef   : > { %1567 = vmatprep.subr.bf16.mxu0 %v1765_v9 }
  0xf1   : > { %1688 = vset.pattern.permute.xlu1 %v1767_v17  ;;  %1687 = vset.pattern.permute.xlu0 %v1767_v17 }
  0xf2   : > { %649 = vperm.xlu1 %1688, %v1851_v14   ;;  %645 = vperm.xlu0 %1687, %v1845_v11  }
  0xf6   : > { %1689 = vset.pattern.permute.xlu1 %v1768_v18  ;;  %1690 = vset.pattern.permute.xlu0 %v1768_v18 }
  0xf7   : > { %1568 = vmatpush3.bf16.xpose.msra.mxu0 %v404_v19  ;;  %744 = vperm.xlu1 %1689, %v1845_v11  }
  0xf8   : > { %748 = vperm.xlu0 %1690, %v1851_v14   ;;  %1573 = vmatprep.subr.bf16.mxu0 %v1765_v9 }
  0xfe   : > { %1570 = vmatmul.mubr.msk.bf16.vlgmr.msra.gmra.mrb[0].mxu0 %vm396_vm2, %v325_v20 }
  0xff   : > { %1574 = vmatpush3.bf16.msra.mxu0 %v1855_v15  ;;  %1577 = vmatprep.mubr.msk.bf16.mxu0 %vm1766_vm1, %v1765_v9 }
 0x100   : > { %1575 = vmatprep.subr.bf16.mxu0 %v1765_v9 }
 0x103   : > { %1576 = vmatpush3.bf16.msra.mxu0 %v1849_v13 }
 0x104   : > { %1581 = vmatprep.subr.bf16.mxu0 %v1765_v9 }
 0x168   : > { %v545_v21 = vpop.permute.xlu1 %544  ;;  %v449_v22 = vpop.permute.xlu0 %448 }
 0x16c   : > { %v549_v24 = vpop.permute.xlu1 %548  ;;  %v454_v25 = vpop.permute.xlu0 %453 }
 0x171   : > { %v650_v28 = vpop.permute.xlu1 %649  ;;  %v646_v29 = vpop.permute.xlu0 %645 }
 0x176   : > { %v745_v42 = vpop.permute.xlu1 %744 }
 0x177   : > { %v749_v44 = vpop.permute.xlu0 %748 }
 0x1d1   : > { %v440_v36 = vpop.f32.mrb[0].mxu0 }
 0x1d2   : > { %v459_v37 = vrot.slane %v440_v36, %v458_v30  ;;  %v554_v38 = vrot.slane %v440_v36, %v553_v31  ;;  %v655_v39 = vrot.slane %v440_v36, %v654_v32  ;;  %v754_v40 = vrot.slane %v440_v36, %v753_v33  ;;  %v1571_v41 = vpop.f32.mrb[1].mxu0 }
 0x1d3   : > { %v443_v43 = vpop.f32.mrb[2].mxu0 }
 0x1d4   : > { %v1572_v45 = vpop.f32.mrb[3].mxu0  ;;  %v461_v46 = vadd.f32 %v459_v37, %v454_v25  ;;  %v460_v47 = vadd.f32 %v459_v37, %v449_v22  ;;  %v556_v48 = vadd.f32 %v554_v38, %v549_v24  ;;  %v555_v49 = vadd.f32 %v554_v38, %v545_v21 }
 0x1d5   : > { %v657_v50 = vadd.f32 %v655_v39, %v650_v28  ;;  %v656_v51 = vadd.f32 %v655_v39, %v646_v29  ;;  %v756_v52 = vadd.f32 %v754_v40, %v749_v44  ;;  %v755_v53 = vadd.f32 %v754_v40, %v745_v42 }
 0x1d6   : > { %vm463_vm5 = vcmp.gt.f32.partialorder %v461_v46, 0.0  ;;  %v465_v54 = vmul.f32 0.2, %v461_v46  ;;  %vm462_vm6 = vcmp.gt.f32.partialorder %v460_v47, 0.0  ;;  %v464_v55 = vmul.f32 0.2, %v460_v47 }
 0x1d7   : > { %vm558_vm7 = vcmp.gt.f32.partialorder %v556_v48, 0.0  ;;  %v560_v56 = vmul.f32 0.2, %v556_v48  ;;  %vm557_vm8 = vcmp.gt.f32.partialorder %v555_v49, 0.0  ;;  %v559_v57 = vmul.f32 0.2, %v555_v49 }
 0x1d8   : > { %v467_v58 = vsel %vm463_vm5, %v461_v46, %v465_v54  ;;  %v466_v59 = vsel %vm462_vm6, %v460_v47, %v464_v55  ;;  %vm659_vm9 = vcmp.gt.f32.partialorder %v657_v50, 0.0  ;;  %v661_v60 = vmul.f32 0.2, %v657_v50 }
 0x1d9   : > { %v471_v61 = vsel %vm469_vm3, %v467_v58, -1e+30  ;;  %v470_v62 = vsel %vm468_vm4, %v466_v59, -1e+30  ;;  %v562_v63 = vsel %vm558_vm7, %v556_v48, %v560_v56  ;;  %v561_v0 = vsel %vm557_vm8, %v555_v49, %v559_v57 }
 0x1da   : > { %v475_v1 = vsel %vm396_vm2, %v471_v61, -inf  ;;  %v472_v2 = vsel %vm396_vm2, %v470_v62, -inf  ;;  %v564_v3 = vsel %vm469_vm3, %v562_v63, -1e+30  ;;  %v563_v4 = vsel %vm468_vm4, %v561_v0, -1e+30 }
 0x1db   : > { %476 = vmax.xlane.f32.xlu0 %v475_v1  ;;  %473 = vmax.xlane.f32.xlu1 %v472_v2  ;;  %vm658_vm10 = vcmp.gt.f32.partialorder %v656_v51, 0.0  ;;  %v663_v5 = vsel %vm659_vm9, %v657_v50, %v661_v60  ;;  %v660_v6 = vmul.f32 0.2, %v656_v51  ;;  %vm758_vm11 = vcmp.gt.f32.partialorder %v756_v52, 0.0 }
 0x1dc   : > { %v760_v7 = vmul.f32 0.2, %v756_v52  ;;  %vm757_vm12 = vcmp.gt.f32.partialorder %v755_v53, 0.0  ;;  %v759_v8 = vmul.f32 0.2, %v755_v53  ;;  %v568_v10 = vsel %vm396_vm2, %v564_v3, -inf }
 0x1dd   : > { %v565_v12 = vsel %vm396_vm2, %v563_v4, -inf  ;;  %v662_v16 = vsel %vm658_vm10, %v656_v51, %v660_v6  ;;  %v665_v17 = vsel %vm469_vm3, %v663_v5, -1e+30 }
 0x1de   : > { %v664_v18 = vsel %vm468_vm4, %v662_v16, -1e+30  ;;  %v762_v19 = vsel %vm758_vm11, %v756_v52, %v760_v7  ;;  %v761_v20 = vsel %vm757_vm12, %v755_v53, %v759_v8  ;;  %v669_v21 = vsel %vm396_vm2, %v665_v17, -inf }
 0x1df   : > { %569 = vmax.xlane.f32.xlu0 %v568_v10  ;;  %566 = vmax.xlane.f32.xlu1 %v565_v12  ;;  %v666_v22 = vsel %vm396_vm2, %v664_v18, -inf  ;;  %v764_v23 = vsel %vm469_vm3, %v762_v19, -1e+30  ;;  %v763_v24 = vsel %vm468_vm4, %v761_v20, -1e+30 }
 0x1e0   : > { %v768_v25 = vsel %vm396_vm2, %v764_v23, -inf  ;;  %v765_v27 = vsel %vm396_vm2, %v763_v24, -inf }
 0x1e3   : > { %670 = vmax.xlane.f32.xlu0 %v669_v21  ;;  %667 = vmax.xlane.f32.xlu1 %v666_v22 }
 0x1e7   : > { %769 = vmax.xlane.f32.xlu0 %v768_v25  ;;  %766 = vmax.xlane.f32.xlu1 %v765_v27 }
 0x1f8   : > { %594 = vrot.lane.b32.xlu1 %v1855_v15, %s1769_s15 }
 0x1fc   : > { %693 = vrot.lane.b32.xlu1 %v1855_v15, %s1770_s16 }
 0x1fd   : > { %596 = vrot.lane.b32.xlu0 %v1849_v13, %s1769_s15 }
 0x200   : > { %792 = vrot.lane.b32.xlu1 %v1855_v15, %s1771_s17 }
 0x268   : > { %v477_v28 = vpop.xlane.xlu0 %476  ;;  %v474_v29 = vpop.xlane.xlu1 %473 }
 0x269   : > { %v479_v36 = vsub.f32 %v471_v61, %v477_v28  ;;  %v478_v37 = vsub.f32 %v470_v62, %v474_v29 }
 0x26b   : > { %v482_v38 = vmul.f32 1.442695, %v479_v36  ;;  %v480_v39 = vmul.f32 1.442695, %v478_v37 }
 0x26c   : > { %v570_v40 = vpop.xlane.xlu0 %569  ;;  %v567_v41 = vpop.xlane.xlu1 %566 }
 0x26d   : > { %1699 = vpow2.f32 %v482_v38  ;;  %v572_v42 = vsub.f32 %v564_v3, %v570_v40  ;;  %v571_v43 = vsub.f32 %v563_v4, %v567_v41 }
 0x26e   : > { %1701 = vpow2.f32 %v480_v39 }
 0x26f   : > { %v575_v44 = vmul.f32 1.442695, %v572_v42  ;;  %v573_v45 = vmul.f32 1.442695, %v571_v43 }
 0x270   : > { %v671_v46 = vpop.xlane.xlu0 %670  ;;  %v668_v47 = vpop.xlane.xlu1 %667 }
 0x271   : > { %1703 = vpow2.f32 %v575_v44  ;;  %v673_v48 = vsub.f32 %v665_v17, %v671_v46  ;;  %v672_v49 = vsub.f32 %v664_v18, %v668_v47 }
 0x272   : > { %1705 = vpow2.f32 %v573_v45 }
 0x273   : > { %v676_v15 = vmul.f32 1.442695, %v673_v48  ;;  %v674_v50 = vmul.f32 1.442695, %v672_v49 }
 0x274   : > { %v770_v51 = vpop.xlane.xlu0 %769  ;;  %v767_v52 = vpop.xlane.xlu1 %766 }
 0x275   : > { %1707 = vpow2.f32 %v676_v15  ;;  %v772_v53 = vsub.f32 %v764_v23, %v770_v51  ;;  %v771_v54 = vsub.f32 %v763_v24, %v767_v52 }
 0x276   : > { %1709 = vpow2.f32 %v674_v50 }
 0x277   : > { %v1700_v55 = vpop.eup %1699  ;;  %v775_v56 = vmul.f32 1.442695, %v772_v53  ;;  %v773_v57 = vmul.f32 1.442695, %v771_v54 }
 0x278   : > { %v1702_v58 = vpop.eup %1701  ;;  %v1937_v59 = vpop.permute.xlu1 %594  ;;  %v485_v60 = vmul.f32 %v1700_v55, %v1891_v34 }
 0x279   : > { %1711 = vpow2.f32 %v775_v56  ;;  %v484_v61 = vmul.f32 %v1702_v58, %v1893_v35  ;;  %v597_v24 = vpop.permute.xlu0 %596 }
 0x27a   : > { %1713 = vpow2.f32 %v773_v57  ;;  %v489_v62 = vsel %vm396_vm2, %v485_v60, 0.0 }
 0x27b   : > { %v1704_v63 = vpop.eup %1703  ;;  %490 = vadd.xlane.f32.xlu0 %v489_v62  ;;  %v486_v0 = vsel %vm396_vm2, %v484_v61, 0.0 }
 0x27c   : > { %v1706_v1 = vpop.eup %1705  ;;  %487 = vadd.xlane.f32.xlu1 %v486_v0  ;;  %v694_v2 = vpop.permute.xlu1 %693  ;;  %v1944_v3 = vmul.f32 %v1704_v63, %v1891_v34 }
 0x27d   : > { %1590 = vmatpush3.bf16.msra.mxu1 %v694_v2  ;;  %v1947_v4 = vmul.f32 %v1706_v1, %v1893_v35 }
 0x27e   : > { %v582_v5 = vsel %vm396_vm2, %v1944_v3, 0.0  ;;  %1591 = vmatprep.subr.bf16.mxu1 %v1765_v9 }
 0x27f   : > { %v1708_v6 = vpop.eup %1707  ;;  %583 = vadd.xlane.f32.xlu0 %v582_v5  ;;  %v579_v7 = vsel %vm396_vm2, %v1947_v4, 0.0 }
 0x280   : > { %v1710_v8 = vpop.eup %1709  ;;  %580 = vadd.xlane.f32.xlu1 %v579_v7  ;;  %v679_v10 = vmul.f32 %v1708_v6, %v1891_v34 }
 0x281   : > { %v678_v12 = vmul.f32 %v1710_v8, %v1893_v35 }
 0x282   : > { %v683_v16 = vsel %vm396_vm2, %v679_v10, 0.0 }
 0x283   : > { %v1712_v17 = vpop.eup %1711  ;;  %684 = vadd.xlane.f32.xlu0 %v683_v16  ;;  %v680_v18 = vsel %vm396_vm2, %v678_v12, 0.0 }
 0x284   : > { %v1714_v19 = vpop.eup %1713  ;;  %681 = vadd.xlane.f32.xlu1 %v680_v18  ;;  %v1959_v20 = vmul.f32 %v1712_v17, %v1891_v34  ;;  %v793_v34 = vpop.permute.xlu1 %792 }
 0x285   : > { %v1962_v21 = vmul.f32 %v1714_v19, %v1893_v35 }
 0x286   : > { %v782_v22 = vsel %vm396_vm2, %v1959_v20, 0.0 }
 0x287   : > { %783 = vadd.xlane.f32.xlu0 %v782_v22  ;;  %v779_v23 = vsel %vm396_vm2, %v1962_v21, 0.0 }
 0x288   : > { %780 = vadd.xlane.f32.xlu1 %v779_v23 }
 0x299   : > { %794 = vrot.lane.b32.xlu1 %v1849_v13, %s1771_s17 }
 0x29d   : > { %695 = vrot.lane.b32.xlu0 %v1849_v13, %s1770_s16 }
 0x308   : > { %v491_v25 = vpop.xlane.xlu0 %490 }
 0x309   : > { %v493_v27 = vadd.f32 1e-16, %v491_v25  ;;  %v488_v35 = vpop.xlane.xlu1 %487  ;;  %v1776_v25 = vmov 40  }
 0x30a   : > { %v492_v28 = vadd.f32 1e-16, %v488_v35  ;;  %1692 = vset.pattern.permute.xlu1 %v1776_v25 }
 0x30b   : > { %1715 = vrcp.f32 %v493_v27  ;;  %v1777_v27 = vmov 41  }
 0x30c   : > { %1717 = vrcp.f32 %v492_v28  ;;  %v584_v29 = vpop.xlane.xlu0 %583  ;;  %1691 = vset.pattern.permute.xlu0 %v1777_v27 }
 0x30d   : > { %v586_v36 = vadd.f32 1e-16, %v584_v29  ;;  %v581_v37 = vpop.xlane.xlu1 %580 }
 0x30e   : > { %v585_v38 = vadd.f32 1e-16, %v581_v37 }
 0x30f   : > { %1719 = vrcp.f32 %v586_v36 }
 0x310   : > { %1721 = vrcp.f32 %v585_v38  ;;  %v685_v39 = vpop.xlane.xlu0 %684 }
 0x311   : > { %v687_v40 = vadd.f32 1e-16, %v685_v39  ;;  %v682_v41 = vpop.xlane.xlu1 %681 }
 0x312   : > { %v686_v42 = vadd.f32 1e-16, %v682_v41 }
 0x313   : > { %1723 = vrcp.f32 %v687_v40  ;;  %v2014_v40 = vld [vmem:[%s2120_s6] ss:$0 sm:$0xff] }
 0x314   : > { %1725 = vrcp.f32 %v686_v42  ;;  %v784_v13 = vpop.xlane.xlu0 %783 }
 0x315   : > { %v1716_v43 = vpop.eup %1715  ;;  %v786_v44 = vadd.f32 1e-16, %v784_v13  ;;  %v781_v45 = vpop.xlane.xlu1 %780 }
 0x316   : > { %v1718_v46 = vpop.eup %1717  ;;  %v497_v47 = vmul.f32 %v1716_v43, %v485_v60  ;;  %v785_v48 = vadd.f32 1e-16, %v781_v45 }
 0x317   : > { %v496_v49 = vmul.f32 %v1718_v46, %v484_v61  ;;  %1727 = vrcp.f32 %v786_v44 }
 0x318   : > { %1729 = vrcp.f32 %v785_v48  ;;  %v696_v15 = vpop.permute.xlu0 %695 }
 0x319   : > { %v1720_v50 = vpop.eup %1719  ;;  %1592 = vmatpush3.bf16.msra.mxu1 %v696_v15  ;;  %v498_v51 = vpack.c.bf16 %v497_v47, %v496_v49  ;;  %v795_v1 = vpop.permute.xlu1 %794 }
 0x31a   : > { %v1722_v52 = vpop.eup %1721  ;;  %1605 = vmatprep.subr.bf16.mxu1 %v1765_v9  ;;  %v590_v54 = vmul.f32 %v1720_v50, %v1944_v3 }
 0x31b   : > { %1578 = vmatmul.mubr.msk.bf16.vlgmr.msra.gmra.mrb[4].mxu0 %vm396_vm2, %v498_v51  ;;  %v589_v55 = vmul.f32 %v1722_v52, %v1947_v4 }
 0x31c   : > { %1582 = vmatpush3.bf16.msra.mxu0 %v1937_v59  ;;  %1585 = vmatprep.mubr.msk.bf16.mxu0 %vm1766_vm1, %v1765_v9 }
 0x31d   : > { %v1724_v53 = vpop.eup %1723  ;;  %1583 = vmatprep.subr.bf16.mxu0 %v1765_v9  ;;  %v591_v61 = vpack.c.bf16 %v590_v54, %v589_v55 }
 0x31e   : > { %v1726_v56 = vpop.eup %1725  ;;  %v691_v57 = vmul.f32 %v1724_v53, %v679_v10 }
 0x31f   : > { %v690_v58 = vmul.f32 %v1726_v56, %v678_v12 }
 0x320   : > { %1584 = vmatpush3.bf16.msra.mxu0 %v597_v24  ;;  %v1696_v24 = vld [vmem:[%s2118_s4] sm:$0xff]  }
 0x321   : > { %v1728_v60 = vpop.eup %1727  ;;  %1597 = vmatprep.subr.bf16.mxu0 %v1765_v9  ;;  %v692_v62 = vpack.c.bf16 %v691_v57, %v690_v58 }
 0x322   : > { %v1730_v59 = vpop.eup %1729  ;;  %v790_v63 = vmul.f32 %v1728_v60, %v1959_v20 }
 0x323   : > { %1586 = vmatmul.mubr.msk.bf16.vlgmr.msra.gmra.mrb[8].mxu0 %vm396_vm2, %v591_v61  ;;  %1594 = vmatmul.mubr.msk.bf16.vlgmr.msra.gmra.mrb[4].mxu1 %vm396_vm2, %v692_v62  ;;  %v789_v0 = vmul.f32 %v1730_v59, %v1962_v21 }
 0x324   : > { %1598 = vmatpush3.bf16.msra.mxu0 %v793_v34  ;;  %1601 = vmatprep.mubr.msk.bf16.mxu0 %vm1766_vm1, %v1765_v9  ;;  %v1697_v34 = vld [vmem:[%s2118_s4 + $0x8] sm:$0xff]  }
 0x325   : > { %1599 = vmatprep.subr.bf16.mxu0 %v1765_v9  ;;  %1609 = vmatprep.mubr.msk.bf16.mxu1 %vm1766_vm1, %v1765_v9  ;;  %v791_v2 = vpack.c.bf16 %v790_v63, %v789_v0  ;;  %v1778_v0 = vmov 42  }
 0x326   : > { %1606 = vmatpush3.bf16.msra.mxu1 %v1696_v24 }
 0x327   : > { %1607 = vmatprep.subr.bf16.mxu1 %v1765_v9 }
 0x328   : > { %1600 = vmatpush3.bf16.msra.mxu0 %v795_v1  ;;  %v1779_v1 = vmov 43  }
 0x329   : > { %1613 = vmatprep.subr.bf16.mxu0 %v1765_v9 }
 0x32a   : > { %1608 = vmatpush3.bf16.msra.mxu1 %v1697_v34 }
 0x32b   : > { %1602 = vmatmul.mubr.msk.bf16.vlgmr.msra.gmra.mrb[12].mxu0 %vm396_vm2, %v791_v2  ;;  %1619 = vmatprep.subr.bf16.mxu1 %v1765_v9 }
 0x32c   : > { %1615 = vmatprep.mubr.msk.bf16.mxu0 %vm1766_vm1, %v1765_v9 }
 0x3ee   : > { %v536_v3 = vpop.f32.mrb[4].mxu0 }
 0x3ef   : > { %v1579_v4 = vpop.f32.mrb[5].mxu0 }
 0x3f0   : > { %v539_v5 = vpop.f32.mrb[6].mxu0 }
 0x3f1   : > { %v1580_v6 = vpop.f32.mrb[7].mxu0 }
 0x3f6   : > { %v637_v7 = vpop.f32.mrb[8].mxu0  ;;  %v736_v8 = vpop.f32.mrb[4].mxu1 }
 0x3f7   : > { %852 = vrot.lane.b32.xlu0 %v736_v8, %s1772_s18  ;;  %v1587_v10 = vpop.f32.mrb[9].mxu0  ;;  %v1595_v12 = vpop.f32.mrb[5].mxu1 }
 0x3f8   : > { %v640_v16 = vpop.f32.mrb[10].mxu0  ;;  %v739_v17 = vpop.f32.mrb[6].mxu1 }
 0x3f9   : > { %854 = vrot.lane.b32.xlu1 %v739_v17, %s1772_s18  ;;  %v1588_v18 = vpop.f32.mrb[11].mxu0  ;;  %v1596_v19 = vpop.f32.mrb[7].mxu1 }
 0x3fb   : > { %844 = vrot.lane.b32.xlu0 %v637_v7, %s1773_s19  ;;  %v323_v7 = vld [vmem:[%s309_s13] sm:$0xf] }
 0x3fc   : > { %v2044_v8 = vunpack.c.l.bf16 %v323_v7 }
 0x3fd   : > { %846 = vrot.lane.b32.xlu1 %v640_v16, %s1773_s19 }
 0x3fe   : > { %v835_v20 = vpop.f32.mrb[12].mxu0 }
 0x3ff   : > { %860 = vrot.lane.b32.xlu0 %v835_v20, %s1774_s20  ;;  %v1603_v21 = vpop.f32.mrb[13].mxu0 }
 0x400   : > { %v838_v22 = vpop.f32.mrb[14].mxu0 }
 0x401   : > { %862 = vrot.lane.b32.xlu1 %v838_v22, %s1774_s20  ;;  %v1604_v23 = vpop.f32.mrb[15].mxu0 }
 0x403   : > { %874 = vrot.lane.b32.xlu0 %v1845_v11, %s1775_s21 }
 0x405   : > { %876 = vrot.lane.b32.xlu1 %v1851_v14, %s1775_s21 }
 0x469   : > { %v853_v11 = vpop.permute.xlu0 %852 }
 0x46b   : > { %v855_v14 = vpop.permute.xlu1 %854 }
 0x46d   : > { %v845_v35 = vpop.permute.xlu0 %844 }
 0x46e   : > { %v867_v29 = vsel %vm866_vm13, %v536_v3, %v845_v35  ;;  %v1698_v3 = vld [vmem:[%s2119_s5] ss:$0 sps:$4 sm:$0xcc]  }
 0x46f   : > { %v847_v28 = vpop.permute.xlu1 %846  ;;  %v869_v39 = vsel %vm338_vm0, %v867_v29, %v853_v11  ;;  %v967_v4 = vrot.slane %v1698_v3, 2 }
 0x470   : > { %v868_v37 = vsel %vm866_vm13, %v539_v5, %v847_v28 }
 0x471   : > { %v861_v36 = vpop.permute.xlu0 %860  ;;  %v870_v43 = vsel %vm338_vm0, %v868_v37, %v855_v14 }
 0x472   : > { %v872_v41 = vsel %vm871_vm14, %v869_v39, %v861_v36 }
 0x473   : > { %v863_v38 = vpop.permute.xlu1 %862 }
 0x474   : > { %v873_v44 = vsel %vm871_vm14, %v870_v43, %v863_v38 }
 0x475   : > { %v875_v42 = vpop.permute.xlu0 %874 }
 0x476   : > { %v880_v13 = vadd.f32 %v875_v42, %v872_v41 }
 0x477   : > { %v877_v45 = vpop.permute.xlu1 %876 }
 0x478   : > { %v888_v46 = vadd.f32 %v2014_v40, %v880_v13  ;;  %v881_v47 = vadd.f32 %v877_v45, %v873_v44 }
 0x47a   : > { %v892_v48 = vmin.f32 %v888_v46, 0.0  ;;  %v889_v49 = vadd.f32 %v2014_v40, %v881_v47  ;;  %vm890_vm15 = vcmp.gt.f32.partialorder %v888_v46, 0.0 }
 0x47c   : > { %v894_v15 = vmul.f32 1.442695, %v892_v48  ;;  %v893_v50 = vmin.f32 %v889_v49, 0.0  ;;  %vm891_vm3 = vcmp.gt.f32.partialorder %v889_v49, 0.0 }
 0x47e   : > { %1731 = vpow2.f32 %v894_v15  ;;  %v896_v51 = vmul.f32 1.442695, %v893_v50 }
 0x480   : > { %1733 = vpow2.f32 %v896_v51 }
 0x488   : > { %v1732_v52 = vpop.eup %1731 }
 0x489   : > { %v1505_v53 = vadd.f32 -1.0, %v1732_v52 }
 0x48a   : > { %v1734_v54 = vpop.eup %1733 }
 0x48b   : > { %v1506_v55 = vadd.f32 -1.0, %v1734_v54  ;;  %v900_v56 = vsel %vm890_vm15, %v888_v46, %v1505_v53 }
 0x48d   : > { %v901_v57 = vsel %vm891_vm3, %v889_v49, %v1506_v55 }
 0x48e   : > { %v902_v58 = vpack.c.bf16 %v901_v57, %v900_v56 }
 0x490   : > { %1610 = vmatmul.mubr.msk.bf16.vlgmr.msra.gmra.mrb[8].mxu1 %vm396_vm2, %v902_v58 }
 0x491   : > { %1621 = vmatprep.mubr.msk.bf16.mxu1 %vm1766_vm1, %v1765_v9 }
 0x563   : > { %v2022_v60 = vpop.f32.mrb[8].mxu1 }
 0x564   : > { %1016 = vperm.xlu1 %1692, %v2022_v60   ;;  %1044 = vperm.xlu0 %1691, %v2022_v60   ;;  %v1611_v61 = vpop.f32.mrb[9].mxu1 }
 0x565   : > { %v959_v62 = vpop.f32.mrb[10].mxu1 }
 0x566   : > { %v2027_v59 = vpack.c.bf16 %v959_v62, %v2022_v60  ;;  %v1612_v63 = vpop.f32.mrb[11].mxu1 }
 0x568   : > { %1693 = vset.pattern.permute.xlu1 %v1778_v0  ;;  %1694 = vset.pattern.permute.xlu0 %v1779_v1  ;;  %v972_v2 = vsel %vm396_vm2, %v2027_v59, 0 }
 0x569   : > { %1161 = vperm.xlu1 %1693, %v2022_v60   ;;  %1235 = vperm.xlu0 %1694, %v2022_v60  }
 0x56a   : > { %1614 = vmatpush3.bf16.xpose.msra.mxu0 %v972_v2 }
 0x56b   : > { %1643 = vmatprep.subr.mxu0 %v1765_v9 }
 0x571   : > { %1616 = vmatmul.mubr.msk.bf16.vlgmr.msra.gmra.mrb[16].mxu0 %vm396_vm2, %v967_v4  ;;  %vm1027_vm2 = vcmp.gt.f32.partialorder %v2044_v8, 0.0 }
 0x572   : > { %1645 = vmatprep.mubr.msk.f32.mxu0 %vm1766_vm1, %v1765_v9 }
 0x5e3   : > { %v1017_v5 = vpop.permute.xlu1 %1016  ;;  %v1045_v6 = vpop.permute.xlu0 %1044 }
 0x5e8   : > { %v1162_v12 = vpop.permute.xlu1 %1161  ;;  %v1236_v21 = vpop.permute.xlu0 %1235 }
 0x644   : > { %v1008_v10 = vpop.f32.mrb[16].mxu0 }
 0x645   : > { %v1022_v16 = vrot.slane %v1008_v10, %v458_v30  ;;  %v1050_v17 = vrot.slane %v1008_v10, %v553_v31  ;;  %v1167_v18 = vrot.slane %v1008_v10, %v654_v32  ;;  %v1241_v19 = vrot.slane %v1008_v10, %v753_v33  ;;  %v1617_v20 = vpop.f32.mrb[17].mxu0 }
 0x646   : > { %v1011_v22 = vpop.f32.mrb[18].mxu0 }
 0x647   : > { %v1618_v23 = vpop.f32.mrb[19].mxu0  ;;  %v1051_v24 = vadd.f32 %v1050_v17, %v1045_v6  ;;  %v1023_v34 = vadd.f32 %v1022_v16, %v1017_v5  ;;  %v1168_v25 = vadd.f32 %v1167_v18, %v1162_v12  ;;  %v1242_v27 = vadd.f32 %v1241_v19, %v1236_v21 }
 0x649   : > { %vm1052_vm4 = vcmp.gt.f32.partialorder %v1051_v24, 0.0  ;;  %v1053_v30 = vmul.f32 0.2, %v1051_v24  ;;  %vm1024_vm5 = vcmp.gt.f32.partialorder %v1023_v34, 0.0  ;;  %v1025_v31 = vmul.f32 0.2, %v1023_v34 }
 0x64a   : > { %vm1169_vm6 = vcmp.gt.f32.partialorder %v1168_v25, 0.0  ;;  %v1170_v11 = vmul.f32 0.2, %v1168_v25  ;;  %vm1243_vm7 = vcmp.gt.f32.partialorder %v1242_v27, 0.0  ;;  %v1244_v32 = vmul.f32 0.2, %v1242_v27 }
 0x64b   : > { %v1054_v26 = vsel %vm1052_vm4, %v1051_v24, %v1053_v30  ;;  %v1026_v33 = vsel %vm1024_vm5, %v1023_v34, %v1025_v31 }
 0x64c   : > { %v1055_v14 = vsel %vm1027_vm2, %v1054_v26, -1e+30  ;;  %v1028_v35 = vsel %vm1027_vm2, %v1026_v33, -1e+30  ;;  %v1171_v28 = vsel %vm1169_vm6, %v1168_v25, %v1170_v11  ;;  %v1245_v29 = vsel %vm1243_vm7, %v1242_v27, %v1244_v32 }
 0x64d   : > { %v1056_v36 = vsel %vm338_vm0, %v1055_v14, -inf  ;;  %v1029_v37 = vsel %vm338_vm0, %v1028_v35, -inf  ;;  %v1172_v38 = vsel %vm1027_vm2, %v1171_v28, -1e+30  ;;  %v1246_v39 = vsel %vm1027_vm2, %v1245_v29, -1e+30 }
 0x64e   : > { %1057 = vmax.xlane.f32.xlu1 %v1056_v36  ;;  %1030 = vmax.xlane.f32.xlu0 %v1029_v37  ;;  %v1173_v41 = vsel %vm338_vm0, %v1172_v38, -inf  ;;  %v1247_v42 = vsel %vm338_vm0, %v1246_v39, -inf }
 0x652   : > { %1174 = vmax.xlane.f32.xlu1 %v1173_v41  ;;  %1248 = vmax.xlane.f32.xlu0 %v1247_v42 }
 0x6db   : > { %v1058_v13 = vpop.xlane.xlu1 %1057  ;;  %v1031_v43 = vpop.xlane.xlu0 %1030 }
 0x6dc   : > { %v1059_v44 = vsub.f32 %v1055_v14, %v1058_v13  ;;  %v1032_v45 = vsub.f32 %v1028_v35, %v1031_v43 }
 0x6de   : > { %v1060_v46 = vmul.f32 1.442695, %v1059_v44  ;;  %v1033_v47 = vmul.f32 1.442695, %v1032_v45 }
 0x6df   : > { %v1175_v48 = vpop.xlane.xlu1 %1174  ;;  %v1249_v49 = vpop.xlane.xlu0 %1248 }
 0x6e0   : > { %1735 = vpow2.f32 %v1060_v46  ;;  %v1176_v15 = vsub.f32 %v1172_v38, %v1175_v48  ;;  %v1250_v50 = vsub.f32 %v1246_v39, %v1249_v49 }
 0x6e1   : > { %1737 = vpow2.f32 %v1033_v47 }
 0x6e2   : > { %v1177_v51 = vmul.f32 1.442695, %v1176_v15  ;;  %v1251_v52 = vmul.f32 1.442695, %v1250_v50 }
 0x6e4   : > { %1739 = vpow2.f32 %v1177_v51 }
 0x6e5   : > { %1741 = vpow2.f32 %v1251_v52 }
 0x6ea   : > { %v1736_v53 = vpop.eup %1735 }
 0x6eb   : > { %v1738_v54 = vpop.eup %1737  ;;  %v1062_v55 = vmul.f32 %v1736_v53, %v2044_v8 }
 0x6ec   : > { %v1035_v56 = vmul.f32 %v1738_v54, %v2044_v8 }
 0x6ed   : > { %v1063_v57 = vsel %vm338_vm0, %v1062_v55, 0.0 }
 0x6ee   : > { %v1740_v58 = vpop.eup %1739  ;;  %1064 = vadd.xlane.f32.xlu1 %v1063_v57  ;;  %v1036_v61 = vsel %vm338_vm0, %v1035_v56, 0.0 }
 0x6ef   : > { %v1742_v62 = vpop.eup %1741  ;;  %1037 = vadd.xlane.f32.xlu0 %v1036_v61  ;;  %v1179_v63 = vmul.f32 %v1740_v58, %v2044_v8 }
 0x6f0   : > { %v1253_v1 = vmul.f32 %v1742_v62, %v2044_v8 }
 0x6f1   : > { %v1180_v0 = vsel %vm338_vm0, %v1179_v63, 0.0 }
 0x6f2   : > { %1181 = vadd.xlane.f32.xlu1 %v1180_v0  ;;  %v1254_v2 = vsel %vm338_vm0, %v1253_v1, 0.0 }
 0x6f6   : > { %1255 = vadd.xlane.f32.xlu1 %v1254_v2 }
 0x705   : > { %1071 = vrot.lane.b32.xlu0 %v2027_v59, %s1769_s15 }
 0x707   : > { %1187 = vrot.lane.b32.xlu1 %v2027_v59, %s1770_s16  ;;  %s313_s16 = scalar_lea.vmem %s2121_s7, %s1521_s11 }
 0x709   : > { %1261 = vrot.lane.b32.xlu0 %v2027_v59, %s1771_s17 }
 0x70b   : > { %1309 = vrot.lane.b32.xlu1 %v2014_v40, %s1775_s21 }
 0x70d   : > { %1313 = vrot.lane.b32.xlu0 %v2022_v60, %s1775_s21 }
 0x77b   : > { %v1065_v3 = vpop.xlane.xlu1 %1064 }
 0x77c   : > { %v1066_v4 = vadd.f32 1e-16, %v1065_v3  ;;  %v1038_v5 = vpop.xlane.xlu0 %1037 }
 0x77d   : > { %v1039_v7 = vadd.f32 1e-16, %v1038_v5 }
 0x77e   : > { %1743 = vrcp.f32 %v1066_v4 }
 0x77f   : > { %1745 = vrcp.f32 %v1039_v7  ;;  %v1182_v12 = vpop.xlane.xlu1 %1181 }
 0x780   : > { %v1072_v6 = vpop.permute.xlu0 %1071  ;;  %v1183_v40 = vadd.f32 1e-16, %v1182_v12 }
 0x781   : > { %1620 = vmatpush3.bf16.msra.mxu1 %v1072_v6 }
 0x782   : > { %1625 = vmatprep.subr.bf16.mxu1 %v1765_v9  ;;  %1747 = vrcp.f32 %v1183_v40 }
 0x783   : > { %v1256_v18 = vpop.xlane.xlu1 %1255 }
 0x784   : > { %v1257_v21 = vadd.f32 1e-16, %v1256_v18  ;;  %v1262_v24 = vpop.permute.xlu0 %1261 }
 0x786   : > { %1749 = vrcp.f32 %v1257_v21 }
 0x787   : > { %v1188_v20 = vpop.permute.xlu1 %1187 }
 0x788   : > { %v1744_v8 = vpop.eup %1743  ;;  %v1314_v35 = vpop.permute.xlu0 %1313 }
 0x789   : > { %v1068_v10 = vmul.f32 %v1744_v8, %v1062_v55  ;;  %v1746_v60 = vpop.eup %1745 }
 0x78a   : > { %v1041_v17 = vmul.f32 %v1746_v60, %v1035_v56 }
 0x78b   : > { %v1069_v16 = vpack.c.bf16 %v1068_v10, %v1068_v10  ;;  %v1310_v31 = vpop.permute.xlu1 %1309 }
 0x78c   : > { %v1042_v19 = vpack.c.bf16 %v1041_v17, %v1041_v17 }
 0x78d   : > { %1622 = vmatmul.mubr.msk.bf16.vlgmr.msra.gmra.mrb[12].mxu1 %vm338_vm0, %v1069_v16 }
 0x78e   : > { %1626 = vmatpush3.bf16.msra.mxu1 %v2027_v59  ;;  %1627 = vmatprep.mubr.msk.bf16.mxu1 %vm1766_vm1, %v1765_v9  ;;  %v1748_v59 = vpop.eup %1747 }
 0x78f   : > { %1631 = vmatprep.subr.bf16.mxu1 %v1765_v9  ;;  %v1185_v22 = vmul.f32 %v1748_v59, %v1179_v63 }
 0x790   : > { %v1750_v34 = vpop.eup %1749 }
 0x791   : > { %v1186_v23 = vpack.c.bf16 %v1185_v22, %v1185_v22  ;;  %v1259_v25 = vmul.f32 %v1750_v34, %v1253_v1 }
 0x793   : > { %v1260_v27 = vpack.c.bf16 %v1259_v25, %v1259_v25 }
 0x799   : > { %1628 = vmatmul.mubr.msk.bf16.vlgmr.msra.gmra.mrb[12].mxu1 %vm338_vm0, %v1042_v19 }
 0x79a   : > { %1632 = vmatpush3.bf16.msra.mxu1 %v1188_v20  ;;  %1633 = vmatprep.mubr.msk.bf16.mxu1 %vm1766_vm1, %v1765_v9 }
 0x79b   : > { %1637 = vmatprep.subr.bf16.mxu1 %v1765_v9 }
 0x7a5   : > { %1634 = vmatmul.mubr.msk.bf16.vlgmr.msra.gmra.mrb[12].mxu1 %vm338_vm0, %v1186_v23 }
 0x7a6   : > { %1638 = vmatpush3.bf16.msra.mxu1 %v1262_v24  ;;  %1639 = vmatprep.mubr.msk.bf16.mxu1 %vm1766_vm1, %v1765_v9 }
 0x7b1   : > { %1640 = vmatmul.mubr.msk.bf16.vlgmr.msra.gmra.mrb[12].mxu1 %vm338_vm0, %v1260_v27 }
 0x884   : > { %v1301_v30 = vpop.f32.mrb[12].mxu1 }
 0x885   : > { %v1308_v11 = vmul.f32 0.25, %v1301_v30  ;;  %v1641_v32 = vpop.f32.mrb[13].mxu1 }
 0x886   : > { %v1304_v26 = vpop.f32.mrb[14].mxu1 }
 0x887   : > { %v1312_v33 = vadd.f32 %v1310_v31, %v1308_v11  ;;  %v1642_v14 = vpop.f32.mrb[15].mxu1 }
 0x889   : > { %v1316_v28 = vadd.f32 %v1314_v35, %v1312_v33 }
 0x88b   : > { %1644 = vmatpush3.xpose.msk.msra.mxu0 %vm866_vm13, %v1316_v28  ;;  %v1317_v29 = vsel %vm866_vm13, %v1316_v28, -inf }
 0x88c   : > { %1318 = vmax.xlane.f32.xlu1 %v1317_v29 }
 0x88e   : > { %1646 = vmatmul.mubr.msk.f32.vlgmr.msra.gmra.mrb[20].mxu0 %vm866_vm13, %v1316_v28 }
 0x919   : > { %v1319_v9 = vpop.xlane.xlu1 %1318 }
 0x91a   : > { %v1320_v36 = vsub.f32 %v1316_v28, %v1319_v9 }
 0x91c   : > { %v1321_v37 = vmul.f32 1.442695, %v1320_v36 }
 0x91e   : > { %1751 = vpow2.f32 %v1321_v37 }
 0x928   : > { %v1752_v38 = vpop.eup %1751 }
 0x929   : > { %v1323_v39 = vsel %vm866_vm13, %v1752_v38, 0.0 }
 0x92a   : > { %1324 = vadd.xlane.f32.xlu0 %v1323_v39 }
 0x961   : > { %v1398_v41 = vpop.f32.mrb[20].mxu0 }
 0x962   : > { %1403 = vrot.lane.b32.xlu0 %v1398_v41, %s1773_s19  ;;  %v1647_v42 = vpop.f32.mrb[21].mxu0 }
 0x9b7   : > { %v1325_v13 = vpop.xlane.xlu0 %1324 }
 0x9b8   : > { %1753 = vlog2.f32 %v1325_v13 }
 0x9c2   : > { %v1754_v43 = vpop.eup %1753 }
 0x9c3   : > { %v1327_v44 = vmul.f32 0.6931472, %v1754_v43 }
 0x9c5   : > { %v1328_v45 = vsub.f32 %v1320_v36, %v1327_v44 }
 0x9d4   : > { %v1404_v46 = vpop.permute.xlu0 %1403 }
 0x9d5   : > { %v1406_v47 = vsel %vm866_vm13, %v1328_v45, %v1404_v46 }
 0x9d6   : > { %1407 = vst.msk [vmem:[%s313_s16] sm:$0xff] %vm338_vm0, %v1406_v47 }
 0x9d7 PF: > { %s17_s24 = sadd.s32 1, %s1761_s24  }
 0x9d8   : > { %p14_p4 = scmp.ge.s32.totalorder %s17_s24, 4  }
 0x9da   :  { %16 = sbr.rel (!%p14_p4) target bundleno = 1 (0x1), region = 84 }

</bundles_post_ra>
